<compile_context>
chip_gen: v7x
topology: tpu7x:2x2x1
jax: 0.10.0
libtpu: 0.0.40
codegen_flags: <defaults>
</compile_context>

<pallas_src>
import functools
import math

import jax
import jax.numpy as jnp
from jax.experimental import pallas as pl
from jax.experimental.pallas import tpu as pltpu


# ----------------------------------------------------------------------------
# Kernel helpers
# ----------------------------------------------------------------------------
def _layer_norm(x, w, b, eps=1e-5):
    mu = jnp.mean(x, axis=-1, keepdims=True)
    xc = x - mu
    var = jnp.mean(xc * xc, axis=-1, keepdims=True)
    return xc * jax.lax.rsqrt(var + eps) * w + b


def _mm(a, b, dtype):
    # GEMM with configurable operand dtype and f32 accumulation on the MXU.
    return jnp.dot(a.astype(dtype), b.astype(dtype),
                   preferred_element_type=jnp.float32)


# ----------------------------------------------------------------------------
# Fused encoder kernel: all layers + optional final LayerNorm
# ----------------------------------------------------------------------------
def fused_encoder_kernel(
    x_ref,
    wq_ref, bq_ref, wk_ref, bk_ref, wv_ref, bv_ref, wo_ref, bo_ref,
    ln1w_ref, ln1b_ref,
    w1_ref, b1_ref, w2_ref, b2_ref,
    ln2w_ref, ln2b_ref,
    fnw_ref, fnb_ref,
    o_ref,
    act_ref,                     # VMEM scratch (tb*S, D) f32, resident over layers
    *, num_heads, apply_final_norm, compute_dtype,
):
    layer = pl.program_id(1)
    tb, S, D = x_ref.shape
    hd = D // num_heads
    scale = 1.0 / math.sqrt(hd)

    # ---- load activations into the resident VMEM slab once per batch tile ----
    @pl.when(layer == 0)
    def _():
        for b in range(tb):
            act_ref[b * S:(b + 1) * S, :] = x_ref[b].astype(jnp.float32)

    x = act_ref[...]                                   # (M, D) f32, M = tb*S

    # ---- multi-head self-attention (projections batched over all rows) ----
    q = _mm(x, wq_ref[0], compute_dtype) + bq_ref[0]
    k = _mm(x, wk_ref[0], compute_dtype) + bk_ref[0]
    v = _mm(x, wv_ref[0], compute_dtype) + bv_ref[0]

    # TODO(synk): src_mask is not plumbed through; only src_mask=None supported.
    batch_rows = []
    for b in range(tb):                                # static unroll
        r0 = b * S
        head_outs = []
        for h in range(num_heads):                     # static unroll
            c0 = h * hd
            qh = q[r0:r0 + S, c0:c0 + hd]
            kh = k[r0:r0 + S, c0:c0 + hd]
            vh = v[r0:r0 + S, c0:c0 + hd]
            s = jnp.dot(qh, kh.T, preferred_element_type=jnp.float32) * scale
            s = s - jnp.max(s, axis=-1, keepdims=True)
            p = jnp.exp(s)
            p = p * pl.reciprocal(jnp.sum(p, axis=-1, keepdims=True), approx=True)
            head_outs.append(jnp.dot(p, vh, preferred_element_type=jnp.float32))
        batch_rows.append(jnp.concatenate(head_outs, axis=-1))
    attn = jnp.concatenate(batch_rows, axis=0)         # (M, D)

    attn = _mm(attn, wo_ref[0], compute_dtype) + bo_ref[0]

    # residual + layer norm 1
    h1 = _layer_norm(x + attn, ln1w_ref[0], ln1b_ref[0])

    # ---- feed-forward (ReLU), batched over all rows ----
    f = _mm(h1, w1_ref[0], compute_dtype) + b1_ref[0]
    f = jnp.maximum(f, 0.0)
    f = _mm(f, w2_ref[0], compute_dtype) + b2_ref[0]

    # residual + layer norm 2 -> carry to next layer in VMEM
    act_ref[...] = _layer_norm(h1 + f, ln2w_ref[0], ln2b_ref[0])

    # ---- last layer: optional final LayerNorm + single HBM writeback ----
    @pl.when(layer == pl.num_programs(1) - 1)
    def _():
        y = act_ref[...]
        if apply_final_norm:
            y = _layer_norm(y, fnw_ref[...], fnb_ref[...])
        # TODO(synk): D=32 (<128 lanes) forces masked stores; the output
        # layout (B, S, D) is fixed by the module contract.
        for b in range(tb):
            o_ref[b] = y[b * S:(b + 1) * S, :].astype(o_ref.dtype)


# ----------------------------------------------------------------------------
# Wrapper: one pallas_call for the whole Encoder.forward
# ----------------------------------------------------------------------------
def encoder_forward(src, layer_params, final_norm_params=None, *,
                    num_heads=4, batch_tile=None, compute_dtype=jnp.float32):
    B, S, D = src.shape
    L = len(layer_params)
    F = layer_params[0]["w1"].shape[-1]

    # Stack per-layer params along a leading layer axis (streamed per layer).
    def stk(name):
        return jnp.stack([p[name] for p in layer_params], axis=0)

    wq, wk, wv, wo = stk("wq"), stk("wk"), stk("wv"), stk("wo")
    bq, bk, bv, bo = stk("bq"), stk("bk"), stk("bv"), stk("bo")
    ln1w, ln1b = stk("ln1w"), stk("ln1b")
    w1, b1, w2, b2 = stk("w1"), stk("b1"), stk("w2"), stk("b2")
    ln2w, ln2b = stk("ln2w"), stk("ln2b")

    apply_final_norm = final_norm_params is not None
    if apply_final_norm:
        fnw, fnb = final_norm_params["w"], final_norm_params["b"]
    else:
        fnw = jnp.ones((1, D), jnp.float32)
        fnb = jnp.zeros((1, D), jnp.float32)

    # Default: whole batch in one tile so the GEMMs see M = B*S.
    # Set batch_tile < B at larger batch sizes to shard the "parallel"
    # axis across v7x's two TensorCores.
    tb = B if batch_tile is None else batch_tile
    assert B % tb == 0, "batch_tile must divide batch"
    nb = B // tb

    def act_map(b, l):          # activations / output: resident over layers
        return (b, 0, 0)

    def lyr3(b, l):             # per-layer weight: streamed over layer axis
        return (l, 0, 0)

    def inv2(b, l):             # grid-invariant final-norm params
        return (0, 0)

    in_specs = [
        pl.BlockSpec((tb, S, D), act_map),          # x
        pl.BlockSpec((1, D, D), lyr3),              # wq
        pl.BlockSpec((1, 1, D), lyr3),              # bq
        pl.BlockSpec((1, D, D), lyr3),              # wk
        pl.BlockSpec((1, 1, D), lyr3),              # bk
        pl.BlockSpec((1, D, D), lyr3),              # wv
        pl.BlockSpec((1, 1, D), lyr3),              # bv
        pl.BlockSpec((1, D, D), lyr3),              # wo
        pl.BlockSpec((1, 1, D), lyr3),              # bo
        pl.BlockSpec((1, 1, D), lyr3),              # ln1w
        pl.BlockSpec((1, 1, D), lyr3),              # ln1b
        pl.BlockSpec((1, D, F), lyr3),              # w1
        pl.BlockSpec((1, 1, F), lyr3),              # b1
        pl.BlockSpec((1, F, D), lyr3),              # w2
        pl.BlockSpec((1, 1, D), lyr3),              # b2
        pl.BlockSpec((1, 1, D), lyr3),              # ln2w
        pl.BlockSpec((1, 1, D), lyr3),              # ln2b
        pl.BlockSpec((1, D), inv2),                 # final-norm w
        pl.BlockSpec((1, D), inv2),                 # final-norm b
    ]

    kernel = functools.partial(
        fused_encoder_kernel,
        num_heads=num_heads,
        apply_final_norm=apply_final_norm,
        compute_dtype=compute_dtype,
    )

    return pl.pallas_call(
        kernel,
        out_shape=jax.ShapeDtypeStruct((B, S, D), src.dtype),
        grid=(nb, L),
        in_specs=in_specs,
        out_specs=pl.BlockSpec((tb, S, D), act_map),
        scratch_shapes=[pltpu.VMEM((tb * S, D), jnp.float32)],
        compiler_params=pltpu.CompilerParams(
            dimension_semantics=("parallel", "arbitrary")),
    )(src, wq, bq, wk, bk, wv, bv, wo, bo, ln1w, ln1b,
      w1, b1, w2, b2, ln2w, ln2b, fnw, fnb)


# ----------------------------------------------------------------------------
# Deterministic parameter construction + pure-JAX reference
# ----------------------------------------------------------------------------
def make_layer_params(key, D, F):
    ks = jax.random.split(key, 16)
    s = 0.05

    def nrm(k, shape, scale):
        return jax.random.normal(k, shape, jnp.float32) * scale

    return {
        "wq": nrm(ks[0], (D, D), s), "bq": nrm(ks[1], (1, D), s),
        "wk": nrm(ks[2], (D, D), s), "bk": nrm(ks[3], (1, D), s),
        "wv": nrm(ks[4], (D, D), s), "bv": nrm(ks[5], (1, D), s),
        "wo": nrm(ks[6], (D, D), s), "bo": nrm(ks[7], (1, D), s),
        "ln1w": 1.0 + nrm(ks[8], (1, D), 0.1), "ln1b": nrm(ks[9], (1, D), 0.1),
        "w1": nrm(ks[10], (D, F), s), "b1": nrm(ks[11], (1, F), s),
        "w2": nrm(ks[12], (F, D), s), "b2": nrm(ks[13], (1, D), s),
        "ln2w": 1.0 + nrm(ks[14], (1, D), 0.1), "ln2b": nrm(ks[15], (1, D), 0.1),
    }


def reference_encoder(src, layer_params, final_norm_params, num_heads):
    def ln(x, w, b, eps=1e-5):
        mu = jnp.mean(x, -1, keepdims=True)
        var = jnp.mean((x - mu) ** 2, -1, keepdims=True)
        return (x - mu) / jnp.sqrt(var + eps) * w[0] + b[0]

    for p in layer_params:
        B, S, D = src.shape
        hd = D // num_heads
        q = (src @ p["wq"] + p["bq"][0]).reshape(B, S, num_heads, hd)
        k = (src @ p["wk"] + p["bk"][0]).reshape(B, S, num_heads, hd)
        v = (src @ p["wv"] + p["bv"][0]).reshape(B, S, num_heads, hd)
        sc = jnp.einsum("bqhd,bkhd->bhqk", q, k) / math.sqrt(hd)
        a = jax.nn.softmax(sc, axis=-1)
        o = jnp.einsum("bhqk,bkhd->bqhd", a, v).reshape(B, S, D)
        o = o @ p["wo"] + p["bo"][0]
        h = ln(src + o, p["ln1w"], p["ln1b"])
        f = jnp.maximum(h @ p["w1"] + p["b1"][0], 0.0) @ p["w2"] + p["b2"][0]
        src = ln(h + f, p["ln2w"], p["ln2b"])
    if final_norm_params is not None:
        src = ln(src, final_norm_params["w"], final_norm_params["b"])
    return src


if __name__ == "__main__":
    B, S, D, F_FF, H = 2, 8, 32, 64, 4
    NUM_LAYERS = 2

    root = jax.random.PRNGKey(0)
    k_in, k_fn, *k_layers = jax.random.split(root, NUM_LAYERS + 2)

    src = jax.random.normal(k_in, (B, S, D), jnp.float32)
    layer_params = [make_layer_params(k, D, F_FF) for k in k_layers]
    kfw, kfb = jax.random.split(k_fn)
    final_norm_params = {
        "w": 1.0 + 0.1 * jax.random.normal(kfw, (1, D), jnp.float32),
        "b": 0.1 * jax.random.normal(kfb, (1, D), jnp.float32),
    }

    out = encoder_forward(src, layer_params, final_norm_params, num_heads=H)
    out = jax.block_until_ready(out)

    ref = reference_encoder(src, layer_params, final_norm_params, H)
    assert out.shape == (B, S, D)
    # Tolerance slightly relaxed vs 1e-4 to cover the EUP approximate-
    # reciprocal softmax denominator (per perf review); f32 GEMM operands
    # keep the rest of the math exact.
    assert jnp.allclose(out, ref, atol=2e-3, rtol=2e-3), "mismatch vs reference"

    print("KERNEL_OK")
</pallas_src>

<mosaic_0001>
module attributes {stable_mosaic.version = 11 : i64} {
  func.func @fused_encoder_kernel(%arg0: i32, %arg1: i32, %arg2: memref<2x8x32xf32, #tpu.memory_space<vmem>>, %arg3: memref<1x32x32xf32, #tpu.memory_space<vmem>>, %arg4: memref<1x1x32xf32, #tpu.memory_space<vmem>>, %arg5: memref<1x32x32xf32, #tpu.memory_space<vmem>>, %arg6: memref<1x1x32xf32, #tpu.memory_space<vmem>>, %arg7: memref<1x32x32xf32, #tpu.memory_space<vmem>>, %arg8: memref<1x1x32xf32, #tpu.memory_space<vmem>>, %arg9: memref<1x32x32xf32, #tpu.memory_space<vmem>>, %arg10: memref<1x1x32xf32, #tpu.memory_space<vmem>>, %arg11: memref<1x1x32xf32, #tpu.memory_space<vmem>>, %arg12: memref<1x1x32xf32, #tpu.memory_space<vmem>>, %arg13: memref<1x32x64xf32, #tpu.memory_space<vmem>>, %arg14: memref<1x1x64xf32, #tpu.memory_space<vmem>>, %arg15: memref<1x64x32xf32, #tpu.memory_space<vmem>>, %arg16: memref<1x1x32xf32, #tpu.memory_space<vmem>>, %arg17: memref<1x1x32xf32, #tpu.memory_space<vmem>>, %arg18: memref<1x1x32xf32, #tpu.memory_space<vmem>>, %arg19: memref<1x32xf32, #tpu.memory_space<vmem>>, %arg20: memref<1x32xf32, #tpu.memory_space<vmem>>, %arg21: memref<2x8x32xf32, #tpu.memory_space<vmem>>, %arg22: memref<16x32xf32, #tpu.memory_space<vmem>>) attributes {dimension_semantics = [#tpu.dimension_semantics<parallel>, #tpu.dimension_semantics<arbitrary>], iteration_bounds = array<i64: 1, 2>, scalar_prefetch = 0 : i64, scratch_operands = 1 : i64, tpu.core_type = #tpu.core_type<tc>, window_params = [{transform_indices = @transform_0, window_bounds = array<i64: 2, 8, 32>}, {transform_indices = @transform_1, window_bounds = array<i64: 1, 32, 32>}, {transform_indices = @transform_2, window_bounds = array<i64: 1, 1, 32>}, {transform_indices = @transform_3, window_bounds = array<i64: 1, 32, 32>}, {transform_indices = @transform_4, window_bounds = array<i64: 1, 1, 32>}, {transform_indices = @transform_5, window_bounds = array<i64: 1, 32, 32>}, {transform_indices = @transform_6, window_bounds = array<i64: 1, 1, 32>}, {transform_indices = @transform_7, window_bounds = array<i64: 1, 32, 32>}, {transform_indices = @transform_8, window_bounds = array<i64: 1, 1, 32>}, {transform_indices = @transform_9, window_bounds = array<i64: 1, 1, 32>}, {transform_indices = @transform_10, window_bounds = array<i64: 1, 1, 32>}, {transform_indices = @transform_11, window_bounds = array<i64: 1, 32, 64>}, {transform_indices = @transform_12, window_bounds = array<i64: 1, 1, 64>}, {transform_indices = @transform_13, window_bounds = array<i64: 1, 64, 32>}, {transform_indices = @transform_14, window_bounds = array<i64: 1, 1, 32>}, {transform_indices = @transform_15, window_bounds = array<i64: 1, 1, 32>}, {transform_indices = @transform_16, window_bounds = array<i64: 1, 1, 32>}, {pipeline_mode = #tpu.pipeline_mode<synchronous>, transform_indices = @transform_17, window_bounds = array<i64: 1, 32>}, {pipeline_mode = #tpu.pipeline_mode<synchronous>, transform_indices = @transform_18, window_bounds = array<i64: 1, 32>}, {transform_indices = @transform_19, window_bounds = array<i64: 2, 8, 32>}]} {
    %c0_i32 = arith.constant 0 : i32
    %0 = arith.cmpi eq, %arg1, %c0_i32 : i32
    %1 = arith.extui %0 : i1 to i32
    %c0_i32_0 = arith.constant 0 : i32
    %2 = arith.cmpi ne, %1, %c0_i32_0 : i32
    scf.if %2 {
      %c0_109 = arith.constant 0 : index
      %c0_110 = arith.constant 0 : index
      %c0_111 = arith.constant 0 : index
      %249 = vector.load %arg2[%c0_109, %c0_110, %c0_111] : memref<2x8x32xf32, #tpu.memory_space<vmem>>, vector<1x8x32xf32>
      %250 = vector.shape_cast %249 : vector<1x8x32xf32> to vector<8x32xf32>
      %c0_112 = arith.constant 0 : index
      %c0_113 = arith.constant 0 : index
      %251 = vector.load %arg22[%c0_112, %c0_113] : memref<16x32xf32, #tpu.memory_space<vmem>>, vector<8x32xf32>
      tpu.vector_store %arg22[%c0_112, %c0_113], %250 {strides = array<i32>} : memref<16x32xf32, #tpu.memory_space<vmem>>, vector<8x32xf32>,
      %c1 = arith.constant 1 : index
      %c0_114 = arith.constant 0 : index
      %c0_115 = arith.constant 0 : index
      %252 = vector.load %arg2[%c1, %c0_114, %c0_115] : memref<2x8x32xf32, #tpu.memory_space<vmem>>, vector<1x8x32xf32>
      %253 = vector.shape_cast %252 : vector<1x8x32xf32> to vector<8x32xf32>
      %c8 = arith.constant 8 : index
      %c0_116 = arith.constant 0 : index
      %254 = vector.load %arg22[%c8, %c0_116] : memref<16x32xf32, #tpu.memory_space<vmem>>, vector<8x32xf32>
      tpu.vector_store %arg22[%c8, %c0_116], %253 {strides = array<i32>} : memref<16x32xf32, #tpu.memory_space<vmem>>, vector<8x32xf32>,
    } else {
    }
    %c0 = arith.constant 0 : index
    %c0_1 = arith.constant 0 : index
    %3 = vector.load %arg22[%c0, %c0_1] : memref<16x32xf32, #tpu.memory_space<vmem>>, vector<16x32xf32>
    %c0_2 = arith.constant 0 : index
    %c0_3 = arith.constant 0 : index
    %c0_4 = arith.constant 0 : index
    %4 = vector.load %arg3[%c0_2, %c0_3, %c0_4] : memref<1x32x32xf32, #tpu.memory_space<vmem>>, vector<1x32x32xf32>
    %5 = vector.shape_cast %4 : vector<1x32x32xf32> to vector<32x32xf32>
    %cst = arith.constant dense<0.000000e+00> : vector<16x32xf32>
    %6 = tpu.matmul %3, %5, %cst {dimension_numbers = #tpu.dot_dimension_numbers<[1], [0], [0], [1], [0, 0, 1, 1], [], []>} : vector<16x32xf32>, vector<32x32xf32>, vector<16x32xf32> -> vector<16x32xf32>
    %c0_5 = arith.constant 0 : index
    %c0_6 = arith.constant 0 : index
    %c0_7 = arith.constant 0 : index
    %7 = vector.load %arg4[%c0_5, %c0_6, %c0_7] : memref<1x1x32xf32, #tpu.memory_space<vmem>>, vector<1x1x32xf32>
    %8 = vector.shape_cast %7 : vector<1x1x32xf32> to vector<1x32xf32>
    %9 = vector.broadcast %8 : vector<1x32xf32> to vector<16x32xf32>
    %10 = arith.addf %6, %9 : vector<16x32xf32>
    %c0_8 = arith.constant 0 : index
    %c0_9 = arith.constant 0 : index
    %c0_10 = arith.constant 0 : index
    %11 = vector.load %arg5[%c0_8, %c0_9, %c0_10] : memref<1x32x32xf32, #tpu.memory_space<vmem>>, vector<1x32x32xf32>
    %12 = vector.shape_cast %11 : vector<1x32x32xf32> to vector<32x32xf32>
    %cst_11 = arith.constant dense<0.000000e+00> : vector<16x32xf32>
    %13 = tpu.matmul %3, %12, %cst_11 {dimension_numbers = #tpu.dot_dimension_numbers<[1], [0], [0], [1], [0, 0, 1, 1], [], []>} : vector<16x32xf32>, vector<32x32xf32>, vector<16x32xf32> -> vector<16x32xf32>
    %c0_12 = arith.constant 0 : index
    %c0_13 = arith.constant 0 : index
    %c0_14 = arith.constant 0 : index
    %14 = vector.load %arg6[%c0_12, %c0_13, %c0_14] : memref<1x1x32xf32, #tpu.memory_space<vmem>>, vector<1x1x32xf32>
    %15 = vector.shape_cast %14 : vector<1x1x32xf32> to vector<1x32xf32>
    %16 = vector.broadcast %15 : vector<1x32xf32> to vector<16x32xf32>
    %17 = arith.addf %13, %16 : vector<16x32xf32>
    %c0_15 = arith.constant 0 : index
    %c0_16 = arith.constant 0 : index
    %c0_17 = arith.constant 0 : index
    %18 = vector.load %arg7[%c0_15, %c0_16, %c0_17] : memref<1x32x32xf32, #tpu.memory_space<vmem>>, vector<1x32x32xf32>
    %19 = vector.shape_cast %18 : vector<1x32x32xf32> to vector<32x32xf32>
    %cst_18 = arith.constant dense<0.000000e+00> : vector<16x32xf32>
    %20 = tpu.matmul %3, %19, %cst_18 {dimension_numbers = #tpu.dot_dimension_numbers<[1], [0], [0], [1], [0, 0, 1, 1], [], []>} : vector<16x32xf32>, vector<32x32xf32>, vector<16x32xf32> -> vector<16x32xf32>
    %c0_19 = arith.constant 0 : index
    %c0_20 = arith.constant 0 : index
    %c0_21 = arith.constant 0 : index
    %21 = vector.load %arg8[%c0_19, %c0_20, %c0_21] : memref<1x1x32xf32, #tpu.memory_space<vmem>>, vector<1x1x32xf32>
    %22 = vector.shape_cast %21 : vector<1x1x32xf32> to vector<1x32xf32>
    %23 = vector.broadcast %22 : vector<1x32xf32> to vector<16x32xf32>
    %24 = arith.addf %20, %23 : vector<16x32xf32>
    %25 = vector.extract_strided_slice %10 {offsets = [0, 0], sizes = [8, 8], strides = [1, 1]} : vector<16x32xf32> to vector<8x8xf32>
    %26 = vector.extract_strided_slice %17 {offsets = [0, 0], sizes = [8, 8], strides = [1, 1]} : vector<16x32xf32> to vector<8x8xf32>
    %27 = vector.extract_strided_slice %24 {offsets = [0, 0], sizes = [8, 8], strides = [1, 1]} : vector<16x32xf32> to vector<8x8xf32>
    %28 = tpu.transpose %26, [1, 0] : vector<8x8xf32> -> vector<8x8xf32>
    %cst_22 = arith.constant dense<0.000000e+00> : vector<8x8xf32>
    %29 = tpu.matmul %25, %28, %cst_22 {dimension_numbers = #tpu.dot_dimension_numbers<[1], [0], [0], [1], [0, 0, 1, 1], [], []>} : vector<8x8xf32>, vector<8x8xf32>, vector<8x8xf32> -> vector<8x8xf32>
    %cst_23 = arith.constant 0.353553385 : f32
    %30 = vector.broadcast %cst_23 : f32 to vector<8x8xf32>
    %31 = arith.mulf %29, %30 : vector<8x8xf32>
    %cst_24 = arith.constant dense<0xFF800000> : vector<8xf32>
    %32 = vector.multi_reduction <maximumf>, %31, %cst_24 [1] : vector<8x8xf32> to vector<8xf32>
    %33 = vector.shape_cast %32 : vector<8xf32> to vector<8x1xf32>
    %34 = vector.broadcast %33 : vector<8x1xf32> to vector<8x8xf32>
    %35 = arith.subf %31, %34 : vector<8x8xf32>
    %36 = math.exp %35 : vector<8x8xf32>
    %cst_25 = arith.constant dense<0.000000e+00> : vector<8xf32>
    %37 = vector.multi_reduction <add>, %36, %cst_25 [1] : vector<8x8xf32> to vector<8xf32>
    %38 = vector.shape_cast %37 : vector<8xf32> to vector<8x1xf32>
    %39 = tpu.reciprocal %38 {approx = true} : vector<8x1xf32> -> vector<8x1xf32>
    %40 = vector.broadcast %39 : vector<8x1xf32> to vector<8x8xf32>
    %41 = arith.mulf %36, %40 : vector<8x8xf32>
    %cst_26 = arith.constant dense<0.000000e+00> : vector<8x8xf32>
    %42 = tpu.matmul %41, %27, %cst_26 {dimension_numbers = #tpu.dot_dimension_numbers<[1], [0], [0], [1], [0, 0, 1, 1], [], []>} : vector<8x8xf32>, vector<8x8xf32>, vector<8x8xf32> -> vector<8x8xf32>
    %43 = vector.extract_strided_slice %10 {offsets = [0, 8], sizes = [8, 8], strides = [1, 1]} : vector<16x32xf32> to vector<8x8xf32>
    %44 = vector.extract_strided_slice %17 {offsets = [0, 8], sizes = [8, 8], strides = [1, 1]} : vector<16x32xf32> to vector<8x8xf32>
    %45 = vector.extract_strided_slice %24 {offsets = [0, 8], sizes = [8, 8], strides = [1, 1]} : vector<16x32xf32> to vector<8x8xf32>
    %46 = tpu.transpose %44, [1, 0] : vector<8x8xf32> -> vector<8x8xf32>
    %cst_27 = arith.constant dense<0.000000e+00> : vector<8x8xf32>
    %47 = tpu.matmul %43, %46, %cst_27 {dimension_numbers = #tpu.dot_dimension_numbers<[1], [0], [0], [1], [0, 0, 1, 1], [], []>} : vector<8x8xf32>, vector<8x8xf32>, vector<8x8xf32> -> vector<8x8xf32>
    %cst_28 = arith.constant 0.353553385 : f32
    %48 = vector.broadcast %cst_28 : f32 to vector<8x8xf32>
    %49 = arith.mulf %47, %48 : vector<8x8xf32>
    %cst_29 = arith.constant dense<0xFF800000> : vector<8xf32>
    %50 = vector.multi_reduction <maximumf>, %49, %cst_29 [1] : vector<8x8xf32> to vector<8xf32>
    %51 = vector.shape_cast %50 : vector<8xf32> to vector<8x1xf32>
    %52 = vector.broadcast %51 : vector<8x1xf32> to vector<8x8xf32>
    %53 = arith.subf %49, %52 : vector<8x8xf32>
    %54 = math.exp %53 : vector<8x8xf32>
    %cst_30 = arith.constant dense<0.000000e+00> : vector<8xf32>
    %55 = vector.multi_reduction <add>, %54, %cst_30 [1] : vector<8x8xf32> to vector<8xf32>
    %56 = vector.shape_cast %55 : vector<8xf32> to vector<8x1xf32>
    %57 = tpu.reciprocal %56 {approx = true} : vector<8x1xf32> -> vector<8x1xf32>
    %58 = vector.broadcast %57 : vector<8x1xf32> to vector<8x8xf32>
    %59 = arith.mulf %54, %58 : vector<8x8xf32>
    %cst_31 = arith.constant dense<0.000000e+00> : vector<8x8xf32>
    %60 = tpu.matmul %59, %45, %cst_31 {dimension_numbers = #tpu.dot_dimension_numbers<[1], [0], [0], [1], [0, 0, 1, 1], [], []>} : vector<8x8xf32>, vector<8x8xf32>, vector<8x8xf32> -> vector<8x8xf32>
    %61 = vector.extract_strided_slice %10 {offsets = [0, 16], sizes = [8, 8], strides = [1, 1]} : vector<16x32xf32> to vector<8x8xf32>
    %62 = vector.extract_strided_slice %17 {offsets = [0, 16], sizes = [8, 8], strides = [1, 1]} : vector<16x32xf32> to vector<8x8xf32>
    %63 = vector.extract_strided_slice %24 {offsets = [0, 16], sizes = [8, 8], strides = [1, 1]} : vector<16x32xf32> to vector<8x8xf32>
    %64 = tpu.transpose %62, [1, 0] : vector<8x8xf32> -> vector<8x8xf32>
    %cst_32 = arith.constant dense<0.000000e+00> : vector<8x8xf32>
    %65 = tpu.matmul %61, %64, %cst_32 {dimension_numbers = #tpu.dot_dimension_numbers<[1], [0], [0], [1], [0, 0, 1, 1], [], []>} : vector<8x8xf32>, vector<8x8xf32>, vector<8x8xf32> -> vector<8x8xf32>
    %cst_33 = arith.constant 0.353553385 : f32
    %66 = vector.broadcast %cst_33 : f32 to vector<8x8xf32>
    %67 = arith.mulf %65, %66 : vector<8x8xf32>
    %cst_34 = arith.constant dense<0xFF800000> : vector<8xf32>
    %68 = vector.multi_reduction <maximumf>, %67, %cst_34 [1] : vector<8x8xf32> to vector<8xf32>
    %69 = vector.shape_cast %68 : vector<8xf32> to vector<8x1xf32>
    %70 = vector.broadcast %69 : vector<8x1xf32> to vector<8x8xf32>
    %71 = arith.subf %67, %70 : vector<8x8xf32>
    %72 = math.exp %71 : vector<8x8xf32>
    %cst_35 = arith.constant dense<0.000000e+00> : vector<8xf32>
    %73 = vector.multi_reduction <add>, %72, %cst_35 [1] : vector<8x8xf32> to vector<8xf32>
    %74 = vector.shape_cast %73 : vector<8xf32> to vector<8x1xf32>
    %75 = tpu.reciprocal %74 {approx = true} : vector<8x1xf32> -> vector<8x1xf32>
    %76 = vector.broadcast %75 : vector<8x1xf32> to vector<8x8xf32>
    %77 = arith.mulf %72, %76 : vector<8x8xf32>
    %cst_36 = arith.constant dense<0.000000e+00> : vector<8x8xf32>
    %78 = tpu.matmul %77, %63, %cst_36 {dimension_numbers = #tpu.dot_dimension_numbers<[1], [0], [0], [1], [0, 0, 1, 1], [], []>} : vector<8x8xf32>, vector<8x8xf32>, vector<8x8xf32> -> vector<8x8xf32>
    %79 = vector.extract_strided_slice %10 {offsets = [0, 24], sizes = [8, 8], strides = [1, 1]} : vector<16x32xf32> to vector<8x8xf32>
    %80 = vector.extract_strided_slice %17 {offsets = [0, 24], sizes = [8, 8], strides = [1, 1]} : vector<16x32xf32> to vector<8x8xf32>
    %81 = vector.extract_strided_slice %24 {offsets = [0, 24], sizes = [8, 8], strides = [1, 1]} : vector<16x32xf32> to vector<8x8xf32>
    %82 = tpu.transpose %80, [1, 0] : vector<8x8xf32> -> vector<8x8xf32>
    %cst_37 = arith.constant dense<0.000000e+00> : vector<8x8xf32>
    %83 = tpu.matmul %79, %82, %cst_37 {dimension_numbers = #tpu.dot_dimension_numbers<[1], [0], [0], [1], [0, 0, 1, 1], [], []>} : vector<8x8xf32>, vector<8x8xf32>, vector<8x8xf32> -> vector<8x8xf32>
    %cst_38 = arith.constant 0.353553385 : f32
    %84 = vector.broadcast %cst_38 : f32 to vector<8x8xf32>
    %85 = arith.mulf %83, %84 : vector<8x8xf32>
    %cst_39 = arith.constant dense<0xFF800000> : vector<8xf32>
    %86 = vector.multi_reduction <maximumf>, %85, %cst_39 [1] : vector<8x8xf32> to vector<8xf32>
    %87 = vector.shape_cast %86 : vector<8xf32> to vector<8x1xf32>
    %88 = vector.broadcast %87 : vector<8x1xf32> to vector<8x8xf32>
    %89 = arith.subf %85, %88 : vector<8x8xf32>
    %90 = math.exp %89 : vector<8x8xf32>
    %cst_40 = arith.constant dense<0.000000e+00> : vector<8xf32>
    %91 = vector.multi_reduction <add>, %90, %cst_40 [1] : vector<8x8xf32> to vector<8xf32>
    %92 = vector.shape_cast %91 : vector<8xf32> to vector<8x1xf32>
    %93 = tpu.reciprocal %92 {approx = true} : vector<8x1xf32> -> vector<8x1xf32>
    %94 = vector.broadcast %93 : vector<8x1xf32> to vector<8x8xf32>
    %95 = arith.mulf %90, %94 : vector<8x8xf32>
    %cst_41 = arith.constant dense<0.000000e+00> : vector<8x8xf32>
    %96 = tpu.matmul %95, %81, %cst_41 {dimension_numbers = #tpu.dot_dimension_numbers<[1], [0], [0], [1], [0, 0, 1, 1], [], []>} : vector<8x8xf32>, vector<8x8xf32>, vector<8x8xf32> -> vector<8x8xf32>
    %97 = tpu.concatenate %42, %60, %78, %96 in 1 : vector<8x8xf32>, vector<8x8xf32>, vector<8x8xf32>, vector<8x8xf32> -> vector<8x32xf32>
    %98 = vector.extract_strided_slice %10 {offsets = [8, 0], sizes = [8, 8], strides = [1, 1]} : vector<16x32xf32> to vector<8x8xf32>
    %99 = vector.extract_strided_slice %17 {offsets = [8, 0], sizes = [8, 8], strides = [1, 1]} : vector<16x32xf32> to vector<8x8xf32>
    %100 = vector.extract_strided_slice %24 {offsets = [8, 0], sizes = [8, 8], strides = [1, 1]} : vector<16x32xf32> to vector<8x8xf32>
    %101 = tpu.transpose %99, [1, 0] : vector<8x8xf32> -> vector<8x8xf32>
    %cst_42 = arith.constant dense<0.000000e+00> : vector<8x8xf32>
    %102 = tpu.matmul %98, %101, %cst_42 {dimension_numbers = #tpu.dot_dimension_numbers<[1], [0], [0], [1], [0, 0, 1, 1], [], []>} : vector<8x8xf32>, vector<8x8xf32>, vector<8x8xf32> -> vector<8x8xf32>
    %cst_43 = arith.constant 0.353553385 : f32
    %103 = vector.broadcast %cst_43 : f32 to vector<8x8xf32>
    %104 = arith.mulf %102, %103 : vector<8x8xf32>
    %cst_44 = arith.constant dense<0xFF800000> : vector<8xf32>
    %105 = vector.multi_reduction <maximumf>, %104, %cst_44 [1] : vector<8x8xf32> to vector<8xf32>
    %106 = vector.shape_cast %105 : vector<8xf32> to vector<8x1xf32>
    %107 = vector.broadcast %106 : vector<8x1xf32> to vector<8x8xf32>
    %108 = arith.subf %104, %107 : vector<8x8xf32>
    %109 = math.exp %108 : vector<8x8xf32>
    %cst_45 = arith.constant dense<0.000000e+00> : vector<8xf32>
    %110 = vector.multi_reduction <add>, %109, %cst_45 [1] : vector<8x8xf32> to vector<8xf32>
    %111 = vector.shape_cast %110 : vector<8xf32> to vector<8x1xf32>
    %112 = tpu.reciprocal %111 {approx = true} : vector<8x1xf32> -> vector<8x1xf32>
    %113 = vector.broadcast %112 : vector<8x1xf32> to vector<8x8xf32>
    %114 = arith.mulf %109, %113 : vector<8x8xf32>
    %cst_46 = arith.constant dense<0.000000e+00> : vector<8x8xf32>
    %115 = tpu.matmul %114, %100, %cst_46 {dimension_numbers = #tpu.dot_dimension_numbers<[1], [0], [0], [1], [0, 0, 1, 1], [], []>} : vector<8x8xf32>, vector<8x8xf32>, vector<8x8xf32> -> vector<8x8xf32>
    %116 = vector.extract_strided_slice %10 {offsets = [8, 8], sizes = [8, 8], strides = [1, 1]} : vector<16x32xf32> to vector<8x8xf32>
    %117 = vector.extract_strided_slice %17 {offsets = [8, 8], sizes = [8, 8], strides = [1, 1]} : vector<16x32xf32> to vector<8x8xf32>
    %118 = vector.extract_strided_slice %24 {offsets = [8, 8], sizes = [8, 8], strides = [1, 1]} : vector<16x32xf32> to vector<8x8xf32>
    %119 = tpu.transpose %117, [1, 0] : vector<8x8xf32> -> vector<8x8xf32>
    %cst_47 = arith.constant dense<0.000000e+00> : vector<8x8xf32>
    %120 = tpu.matmul %116, %119, %cst_47 {dimension_numbers = #tpu.dot_dimension_numbers<[1], [0], [0], [1], [0, 0, 1, 1], [], []>} : vector<8x8xf32>, vector<8x8xf32>, vector<8x8xf32> -> vector<8x8xf32>
    %cst_48 = arith.constant 0.353553385 : f32
    %121 = vector.broadcast %cst_48 : f32 to vector<8x8xf32>
    %122 = arith.mulf %120, %121 : vector<8x8xf32>
    %cst_49 = arith.constant dense<0xFF800000> : vector<8xf32>
    %123 = vector.multi_reduction <maximumf>, %122, %cst_49 [1] : vector<8x8xf32> to vector<8xf32>
    %124 = vector.shape_cast %123 : vector<8xf32> to vector<8x1xf32>
    %125 = vector.broadcast %124 : vector<8x1xf32> to vector<8x8xf32>
    %126 = arith.subf %122, %125 : vector<8x8xf32>
    %127 = math.exp %126 : vector<8x8xf32>
    %cst_50 = arith.constant dense<0.000000e+00> : vector<8xf32>
    %128 = vector.multi_reduction <add>, %127, %cst_50 [1] : vector<8x8xf32> to vector<8xf32>
    %129 = vector.shape_cast %128 : vector<8xf32> to vector<8x1xf32>
    %130 = tpu.reciprocal %129 {approx = true} : vector<8x1xf32> -> vector<8x1xf32>
    %131 = vector.broadcast %130 : vector<8x1xf32> to vector<8x8xf32>
    %132 = arith.mulf %127, %131 : vector<8x8xf32>
    %cst_51 = arith.constant dense<0.000000e+00> : vector<8x8xf32>
    %133 = tpu.matmul %132, %118, %cst_51 {dimension_numbers = #tpu.dot_dimension_numbers<[1], [0], [0], [1], [0, 0, 1, 1], [], []>} : vector<8x8xf32>, vector<8x8xf32>, vector<8x8xf32> -> vector<8x8xf32>
    %134 = vector.extract_strided_slice %10 {offsets = [8, 16], sizes = [8, 8], strides = [1, 1]} : vector<16x32xf32> to vector<8x8xf32>
    %135 = vector.extract_strided_slice %17 {offsets = [8, 16], sizes = [8, 8], strides = [1, 1]} : vector<16x32xf32> to vector<8x8xf32>
    %136 = vector.extract_strided_slice %24 {offsets = [8, 16], sizes = [8, 8], strides = [1, 1]} : vector<16x32xf32> to vector<8x8xf32>
    %137 = tpu.transpose %135, [1, 0] : vector<8x8xf32> -> vector<8x8xf32>
    %cst_52 = arith.constant dense<0.000000e+00> : vector<8x8xf32>
    %138 = tpu.matmul %134, %137, %cst_52 {dimension_numbers = #tpu.dot_dimension_numbers<[1], [0], [0], [1], [0, 0, 1, 1], [], []>} : vector<8x8xf32>, vector<8x8xf32>, vector<8x8xf32> -> vector<8x8xf32>
    %cst_53 = arith.constant 0.353553385 : f32
    %139 = vector.broadcast %cst_53 : f32 to vector<8x8xf32>
    %140 = arith.mulf %138, %139 : vector<8x8xf32>
    %cst_54 = arith.constant dense<0xFF800000> : vector<8xf32>
    %141 = vector.multi_reduction <maximumf>, %140, %cst_54 [1] : vector<8x8xf32> to vector<8xf32>
    %142 = vector.shape_cast %141 : vector<8xf32> to vector<8x1xf32>
    %143 = vector.broadcast %142 : vector<8x1xf32> to vector<8x8xf32>
    %144 = arith.subf %140, %143 : vector<8x8xf32>
    %145 = math.exp %144 : vector<8x8xf32>
    %cst_55 = arith.constant dense<0.000000e+00> : vector<8xf32>
    %146 = vector.multi_reduction <add>, %145, %cst_55 [1] : vector<8x8xf32> to vector<8xf32>
    %147 = vector.shape_cast %146 : vector<8xf32> to vector<8x1xf32>
    %148 = tpu.reciprocal %147 {approx = true} : vector<8x1xf32> -> vector<8x1xf32>
    %149 = vector.broadcast %148 : vector<8x1xf32> to vector<8x8xf32>
    %150 = arith.mulf %145, %149 : vector<8x8xf32>
    %cst_56 = arith.constant dense<0.000000e+00> : vector<8x8xf32>
    %151 = tpu.matmul %150, %136, %cst_56 {dimension_numbers = #tpu.dot_dimension_numbers<[1], [0], [0], [1], [0, 0, 1, 1], [], []>} : vector<8x8xf32>, vector<8x8xf32>, vector<8x8xf32> -> vector<8x8xf32>
    %152 = vector.extract_strided_slice %10 {offsets = [8, 24], sizes = [8, 8], strides = [1, 1]} : vector<16x32xf32> to vector<8x8xf32>
    %153 = vector.extract_strided_slice %17 {offsets = [8, 24], sizes = [8, 8], strides = [1, 1]} : vector<16x32xf32> to vector<8x8xf32>
    %154 = vector.extract_strided_slice %24 {offsets = [8, 24], sizes = [8, 8], strides = [1, 1]} : vector<16x32xf32> to vector<8x8xf32>
    %155 = tpu.transpose %153, [1, 0] : vector<8x8xf32> -> vector<8x8xf32>
    %cst_57 = arith.constant dense<0.000000e+00> : vector<8x8xf32>
    %156 = tpu.matmul %152, %155, %cst_57 {dimension_numbers = #tpu.dot_dimension_numbers<[1], [0], [0], [1], [0, 0, 1, 1], [], []>} : vector<8x8xf32>, vector<8x8xf32>, vector<8x8xf32> -> vector<8x8xf32>
    %cst_58 = arith.constant 0.353553385 : f32
    %157 = vector.broadcast %cst_58 : f32 to vector<8x8xf32>
    %158 = arith.mulf %156, %157 : vector<8x8xf32>
    %cst_59 = arith.constant dense<0xFF800000> : vector<8xf32>
    %159 = vector.multi_reduction <maximumf>, %158, %cst_59 [1] : vector<8x8xf32> to vector<8xf32>
    %160 = vector.shape_cast %159 : vector<8xf32> to vector<8x1xf32>
    %161 = vector.broadcast %160 : vector<8x1xf32> to vector<8x8xf32>
    %162 = arith.subf %158, %161 : vector<8x8xf32>
    %163 = math.exp %162 : vector<8x8xf32>
    %cst_60 = arith.constant dense<0.000000e+00> : vector<8xf32>
    %164 = vector.multi_reduction <add>, %163, %cst_60 [1] : vector<8x8xf32> to vector<8xf32>
    %165 = vector.shape_cast %164 : vector<8xf32> to vector<8x1xf32>
    %166 = tpu.reciprocal %165 {approx = true} : vector<8x1xf32> -> vector<8x1xf32>
    %167 = vector.broadcast %166 : vector<8x1xf32> to vector<8x8xf32>
    %168 = arith.mulf %163, %167 : vector<8x8xf32>
    %cst_61 = arith.constant dense<0.000000e+00> : vector<8x8xf32>
    %169 = tpu.matmul %168, %154, %cst_61 {dimension_numbers = #tpu.dot_dimension_numbers<[1], [0], [0], [1], [0, 0, 1, 1], [], []>} : vector<8x8xf32>, vector<8x8xf32>, vector<8x8xf32> -> vector<8x8xf32>
    %170 = tpu.concatenate %115, %133, %151, %169 in 1 : vector<8x8xf32>, vector<8x8xf32>, vector<8x8xf32>, vector<8x8xf32> -> vector<8x32xf32>
    %171 = tpu.concatenate %97, %170 in 0 : vector<8x32xf32>, vector<8x32xf32> -> vector<16x32xf32>
    %c0_62 = arith.constant 0 : index
    %c0_63 = arith.constant 0 : index
    %c0_64 = arith.constant 0 : index
    %172 = vector.load %arg9[%c0_62, %c0_63, %c0_64] : memref<1x32x32xf32, #tpu.memory_space<vmem>>, vector<1x32x32xf32>
    %173 = vector.shape_cast %172 : vector<1x32x32xf32> to vector<32x32xf32>
    %cst_65 = arith.constant dense<0.000000e+00> : vector<16x32xf32>
    %174 = tpu.matmul %171, %173, %cst_65 {dimension_numbers = #tpu.dot_dimension_numbers<[1], [0], [0], [1], [0, 0, 1, 1], [], []>} : vector<16x32xf32>, vector<32x32xf32>, vector<16x32xf32> -> vector<16x32xf32>
    %c0_66 = arith.constant 0 : index
    %c0_67 = arith.constant 0 : index
    %c0_68 = arith.constant 0 : index
    %175 = vector.load %arg10[%c0_66, %c0_67, %c0_68] : memref<1x1x32xf32, #tpu.memory_space<vmem>>, vector<1x1x32xf32>
    %176 = vector.shape_cast %175 : vector<1x1x32xf32> to vector<1x32xf32>
    %177 = vector.broadcast %176 : vector<1x32xf32> to vector<16x32xf32>
    %178 = arith.addf %174, %177 : vector<16x32xf32>
    %179 = arith.addf %3, %178 : vector<16x32xf32>
    %c0_69 = arith.constant 0 : index
    %c0_70 = arith.constant 0 : index
    %c0_71 = arith.constant 0 : index
    %180 = vector.load %arg11[%c0_69, %c0_70, %c0_71] : memref<1x1x32xf32, #tpu.memory_space<vmem>>, vector<1x1x32xf32>
    %181 = vector.shape_cast %180 : vector<1x1x32xf32> to vector<1x32xf32>
    %c0_72 = arith.constant 0 : index
    %c0_73 = arith.constant 0 : index
    %c0_74 = arith.constant 0 : index
    %182 = vector.load %arg12[%c0_72, %c0_73, %c0_74] : memref<1x1x32xf32, #tpu.memory_space<vmem>>, vector<1x1x32xf32>
    %183 = vector.shape_cast %182 : vector<1x1x32xf32> to vector<1x32xf32>
    %cst_75 = arith.constant dense<0.000000e+00> : vector<16xf32>
    %184 = vector.multi_reduction <add>, %179, %cst_75 [1] : vector<16x32xf32> to vector<16xf32>
    %185 = vector.shape_cast %184 : vector<16xf32> to vector<16x1xf32>
    %cst_76 = arith.constant 3.200000e+01 : f32
    %186 = vector.broadcast %cst_76 : f32 to vector<16x1xf32>
    %187 = arith.divf %185, %186 : vector<16x1xf32>
    %188 = vector.broadcast %187 : vector<16x1xf32> to vector<16x32xf32>
    %189 = arith.subf %179, %188 : vector<16x32xf32>
    %190 = arith.mulf %189, %189 : vector<16x32xf32>
    %cst_77 = arith.constant dense<0.000000e+00> : vector<16xf32>
    %191 = vector.multi_reduction <add>, %190, %cst_77 [1] : vector<16x32xf32> to vector<16xf32>
    %192 = vector.shape_cast %191 : vector<16xf32> to vector<16x1xf32>
    %cst_78 = arith.constant 3.200000e+01 : f32
    %193 = vector.broadcast %cst_78 : f32 to vector<16x1xf32>
    %194 = arith.divf %192, %193 : vector<16x1xf32>
    %cst_79 = arith.constant 9.99999974E-6 : f32
    %195 = vector.broadcast %cst_79 : f32 to vector<16x1xf32>
    %196 = arith.addf %194, %195 : vector<16x1xf32>
    %197 = math.rsqrt %196 : vector<16x1xf32>
    %198 = vector.broadcast %197 : vector<16x1xf32> to vector<16x32xf32>
    %199 = arith.mulf %189, %198 : vector<16x32xf32>
    %200 = vector.broadcast %181 : vector<1x32xf32> to vector<16x32xf32>
    %201 = arith.mulf %199, %200 : vector<16x32xf32>
    %202 = vector.broadcast %183 : vector<1x32xf32> to vector<16x32xf32>
    %203 = arith.addf %201, %202 : vector<16x32xf32>
    %c0_80 = arith.constant 0 : index
    %c0_81 = arith.constant 0 : index
    %c0_82 = arith.constant 0 : index
    %204 = vector.load %arg13[%c0_80, %c0_81, %c0_82] : memref<1x32x64xf32, #tpu.memory_space<vmem>>, vector<1x32x64xf32>
    %205 = vector.shape_cast %204 : vector<1x32x64xf32> to vector<32x64xf32>
    %cst_83 = arith.constant dense<0.000000e+00> : vector<16x64xf32>
    %206 = tpu.matmul %203, %205, %cst_83 {dimension_numbers = #tpu.dot_dimension_numbers<[1], [0], [0], [1], [0, 0, 1, 1], [], []>} : vector<16x32xf32>, vector<32x64xf32>, vector<16x64xf32> -> vector<16x64xf32>
    %c0_84 = arith.constant 0 : index
    %c0_85 = arith.constant 0 : index
    %c0_86 = arith.constant 0 : index
    %207 = vector.load %arg14[%c0_84, %c0_85, %c0_86] : memref<1x1x64xf32, #tpu.memory_space<vmem>>, vector<1x1x64xf32>
    %208 = vector.shape_cast %207 : vector<1x1x64xf32> to vector<1x64xf32>
    %209 = vector.broadcast %208 : vector<1x64xf32> to vector<16x64xf32>
    %210 = arith.addf %206, %209 : vector<16x64xf32>
    %cst_87 = arith.constant 0.000000e+00 : f32
    %211 = vector.broadcast %cst_87 : f32 to vector<16x64xf32>
    %212 = arith.maximumf %210, %211 : vector<16x64xf32>
    %c0_88 = arith.constant 0 : index
    %c0_89 = arith.constant 0 : index
    %c0_90 = arith.constant 0 : index
    %213 = vector.load %arg15[%c0_88, %c0_89, %c0_90] : memref<1x64x32xf32, #tpu.memory_space<vmem>>, vector<1x64x32xf32>
    %214 = vector.shape_cast %213 : vector<1x64x32xf32> to vector<64x32xf32>
    %cst_91 = arith.constant dense<0.000000e+00> : vector<16x32xf32>
    %215 = tpu.matmul %212, %214, %cst_91 {dimension_numbers = #tpu.dot_dimension_numbers<[1], [0], [0], [1], [0, 0, 1, 1], [], []>} : vector<16x64xf32>, vector<64x32xf32>, vector<16x32xf32> -> vector<16x32xf32>
    %c0_92 = arith.constant 0 : index
    %c0_93 = arith.constant 0 : index
    %c0_94 = arith.constant 0 : index
    %216 = vector.load %arg16[%c0_92, %c0_93, %c0_94] : memref<1x1x32xf32, #tpu.memory_space<vmem>>, vector<1x1x32xf32>
    %217 = vector.shape_cast %216 : vector<1x1x32xf32> to vector<1x32xf32>
    %218 = vector.broadcast %217 : vector<1x32xf32> to vector<16x32xf32>
    %219 = arith.addf %215, %218 : vector<16x32xf32>
    %220 = arith.addf %203, %219 : vector<16x32xf32>
    %c0_95 = arith.constant 0 : index
    %c0_96 = arith.constant 0 : index
    %c0_97 = arith.constant 0 : index
    %221 = vector.load %arg17[%c0_95, %c0_96, %c0_97] : memref<1x1x32xf32, #tpu.memory_space<vmem>>, vector<1x1x32xf32>
    %222 = vector.shape_cast %221 : vector<1x1x32xf32> to vector<1x32xf32>
    %c0_98 = arith.constant 0 : index
    %c0_99 = arith.constant 0 : index
    %c0_100 = arith.constant 0 : index
    %223 = vector.load %arg18[%c0_98, %c0_99, %c0_100] : memref<1x1x32xf32, #tpu.memory_space<vmem>>, vector<1x1x32xf32>
    %224 = vector.shape_cast %223 : vector<1x1x32xf32> to vector<1x32xf32>
    %cst_101 = arith.constant dense<0.000000e+00> : vector<16xf32>
    %225 = vector.multi_reduction <add>, %220, %cst_101 [1] : vector<16x32xf32> to vector<16xf32>
    %226 = vector.shape_cast %225 : vector<16xf32> to vector<16x1xf32>
    %cst_102 = arith.constant 3.200000e+01 : f32
    %227 = vector.broadcast %cst_102 : f32 to vector<16x1xf32>
    %228 = arith.divf %226, %227 : vector<16x1xf32>
    %229 = vector.broadcast %228 : vector<16x1xf32> to vector<16x32xf32>
    %230 = arith.subf %220, %229 : vector<16x32xf32>
    %231 = arith.mulf %230, %230 : vector<16x32xf32>
    %cst_103 = arith.constant dense<0.000000e+00> : vector<16xf32>
    %232 = vector.multi_reduction <add>, %231, %cst_103 [1] : vector<16x32xf32> to vector<16xf32>
    %233 = vector.shape_cast %232 : vector<16xf32> to vector<16x1xf32>
    %cst_104 = arith.constant 3.200000e+01 : f32
    %234 = vector.broadcast %cst_104 : f32 to vector<16x1xf32>
    %235 = arith.divf %233, %234 : vector<16x1xf32>
    %cst_105 = arith.constant 9.99999974E-6 : f32
    %236 = vector.broadcast %cst_105 : f32 to vector<16x1xf32>
    %237 = arith.addf %235, %236 : vector<16x1xf32>
    %238 = math.rsqrt %237 : vector<16x1xf32>
    %239 = vector.broadcast %238 : vector<16x1xf32> to vector<16x32xf32>
    %240 = arith.mulf %230, %239 : vector<16x32xf32>
    %241 = vector.broadcast %222 : vector<1x32xf32> to vector<16x32xf32>
    %242 = arith.mulf %240, %241 : vector<16x32xf32>
    %243 = vector.broadcast %224 : vector<1x32xf32> to vector<16x32xf32>
    %244 = arith.addf %242, %243 : vector<16x32xf32>
    %c0_106 = arith.constant 0 : index
    %c0_107 = arith.constant 0 : index
    %245 = vector.load %arg22[%c0_106, %c0_107] : memref<16x32xf32, #tpu.memory_space<vmem>>, vector<16x32xf32>
    tpu.vector_store %arg22[%c0_106, %c0_107], %244 {strides = array<i32>} : memref<16x32xf32, #tpu.memory_space<vmem>>, vector<16x32xf32>,
    %c1_i32 = arith.constant 1 : i32
    %246 = arith.cmpi eq, %arg1, %c1_i32 : i32
    %247 = arith.extui %246 : i1 to i32
    %c0_i32_108 = arith.constant 0 : i32
    %248 = arith.cmpi ne, %247, %c0_i32_108 : i32
    scf.if %248 {
      %c0_109 = arith.constant 0 : index
      %c0_110 = arith.constant 0 : index
      %249 = vector.load %arg22[%c0_109, %c0_110] : memref<16x32xf32, #tpu.memory_space<vmem>>, vector<16x32xf32>
      %c0_111 = arith.constant 0 : index
      %c0_112 = arith.constant 0 : index
      %250 = vector.load %arg19[%c0_111, %c0_112] : memref<1x32xf32, #tpu.memory_space<vmem>>, vector<1x32xf32>
      %c0_113 = arith.constant 0 : index
      %c0_114 = arith.constant 0 : index
      %251 = vector.load %arg20[%c0_113, %c0_114] : memref<1x32xf32, #tpu.memory_space<vmem>>, vector<1x32xf32>
      %cst_115 = arith.constant dense<0.000000e+00> : vector<16xf32>
      %252 = vector.multi_reduction <add>, %249, %cst_115 [1] : vector<16x32xf32> to vector<16xf32>
      %253 = vector.shape_cast %252 : vector<16xf32> to vector<16x1xf32>
      %cst_116 = arith.constant 3.200000e+01 : f32
      %254 = vector.broadcast %cst_116 : f32 to vector<16x1xf32>
      %255 = arith.divf %253, %254 : vector<16x1xf32>
      %256 = vector.broadcast %255 : vector<16x1xf32> to vector<16x32xf32>
      %257 = arith.subf %249, %256 : vector<16x32xf32>
      %258 = arith.mulf %257, %257 : vector<16x32xf32>
      %cst_117 = arith.constant dense<0.000000e+00> : vector<16xf32>
      %259 = vector.multi_reduction <add>, %258, %cst_117 [1] : vector<16x32xf32> to vector<16xf32>
      %260 = vector.shape_cast %259 : vector<16xf32> to vector<16x1xf32>
      %cst_118 = arith.constant 3.200000e+01 : f32
      %261 = vector.broadcast %cst_118 : f32 to vector<16x1xf32>
      %262 = arith.divf %260, %261 : vector<16x1xf32>
      %cst_119 = arith.constant 9.99999974E-6 : f32
      %263 = vector.broadcast %cst_119 : f32 to vector<16x1xf32>
      %264 = arith.addf %262, %263 : vector<16x1xf32>
      %265 = math.rsqrt %264 : vector<16x1xf32>
      %266 = vector.broadcast %265 : vector<16x1xf32> to vector<16x32xf32>
      %267 = arith.mulf %257, %266 : vector<16x32xf32>
      %268 = vector.broadcast %250 : vector<1x32xf32> to vector<16x32xf32>
      %269 = arith.mulf %267, %268 : vector<16x32xf32>
      %270 = vector.broadcast %251 : vector<1x32xf32> to vector<16x32xf32>
      %271 = arith.addf %269, %270 : vector<16x32xf32>
      %272 = vector.extract_strided_slice %271 {offsets = [0, 0], sizes = [8, 32], strides = [1, 1]} : vector<16x32xf32> to vector<8x32xf32>
      %c0_120 = arith.constant 0 : index
      %c0_121 = arith.constant 0 : index
      %c0_122 = arith.constant 0 : index
      %273 = vector.load %arg21[%c0_120, %c0_121, %c0_122] : memref<2x8x32xf32, #tpu.memory_space<vmem>>, vector<1x8x32xf32>
      %274 = vector.shape_cast %273 : vector<1x8x32xf32> to vector<8x32xf32>
      %275 = vector.shape_cast %272 : vector<8x32xf32> to vector<1x8x32xf32>
      tpu.vector_store %arg21[%c0_120, %c0_121, %c0_122], %275 {strides = array<i32>} : memref<2x8x32xf32, #tpu.memory_space<vmem>>, vector<1x8x32xf32>,
      %276 = vector.extract_strided_slice %271 {offsets = [8, 0], sizes = [8, 32], strides = [1, 1]} : vector<16x32xf32> to vector<8x32xf32>
      %c1 = arith.constant 1 : index
      %c0_123 = arith.constant 0 : index
      %c0_124 = arith.constant 0 : index
      %277 = vector.load %arg21[%c1, %c0_123, %c0_124] : memref<2x8x32xf32, #tpu.memory_space<vmem>>, vector<1x8x32xf32>
      %278 = vector.shape_cast %277 : vector<1x8x32xf32> to vector<8x32xf32>
      %279 = vector.shape_cast %276 : vector<8x32xf32> to vector<1x8x32xf32>
      tpu.vector_store %arg21[%c1, %c0_123, %c0_124], %279 {strides = array<i32>} : memref<2x8x32xf32, #tpu.memory_space<vmem>>, vector<1x8x32xf32>,
    } else {
    }
    return
  }
  func.func @transform_0(%arg0: i32, %arg1: i32) -> (i32, i32, i32) {
    %c0_i32 = arith.constant 0 : i32
    %c0_i32_0 = arith.constant 0 : i32
    %c0_i32_1 = arith.constant 0 : i32
    return %arg0, %c0_i32, %c0_i32_0 : i32, i32, i32
  }
  func.func @transform_1(%arg0: i32, %arg1: i32) -> (i32, i32, i32) {
    %c0_i32 = arith.constant 0 : i32
    %c0_i32_0 = arith.constant 0 : i32
    %c0_i32_1 = arith.constant 0 : i32
    return %arg1, %c0_i32, %c0_i32_0 : i32, i32, i32
  }
  func.func @transform_2(%arg0: i32, %arg1: i32) -> (i32, i32, i32) {
    %c0_i32 = arith.constant 0 : i32
    %c0_i32_0 = arith.constant 0 : i32
    %c0_i32_1 = arith.constant 0 : i32
    return %arg1, %c0_i32, %c0_i32_0 : i32, i32, i32
  }
  func.func @transform_3(%arg0: i32, %arg1: i32) -> (i32, i32, i32) {
    %c0_i32 = arith.constant 0 : i32
    %c0_i32_0 = arith.constant 0 : i32
    %c0_i32_1 = arith.constant 0 : i32
    return %arg1, %c0_i32, %c0_i32_0 : i32, i32, i32
  }
  func.func @transform_4(%arg0: i32, %arg1: i32) -> (i32, i32, i32) {
    %c0_i32 = arith.constant 0 : i32
    %c0_i32_0 = arith.constant 0 : i32
    %c0_i32_1 = arith.constant 0 : i32
    return %arg1, %c0_i32, %c0_i32_0 : i32, i32, i32
  }
  func.func @transform_5(%arg0: i32, %arg1: i32) -> (i32, i32, i32) {
    %c0_i32 = arith.constant 0 : i32
    %c0_i32_0 = arith.constant 0 : i32
    %c0_i32_1 = arith.constant 0 : i32
    return %arg1, %c0_i32, %c0_i32_0 : i32, i32, i32
  }
  func.func @transform_6(%arg0: i32, %arg1: i32) -> (i32, i32, i32) {
    %c0_i32 = arith.constant 0 : i32
    %c0_i32_0 = arith.constant 0 : i32
    %c0_i32_1 = arith.constant 0 : i32
    return %arg1, %c0_i32, %c0_i32_0 : i32, i32, i32
  }
  func.func @transform_7(%arg0: i32, %arg1: i32) -> (i32, i32, i32) {
    %c0_i32 = arith.constant 0 : i32
    %c0_i32_0 = arith.constant 0 : i32
    %c0_i32_1 = arith.constant 0 : i32
    return %arg1, %c0_i32, %c0_i32_0 : i32, i32, i32
  }
  func.func @transform_8(%arg0: i32, %arg1: i32) -> (i32, i32, i32) {
    %c0_i32 = arith.constant 0 : i32
    %c0_i32_0 = arith.constant 0 : i32
    %c0_i32_1 = arith.constant 0 : i32
    return %arg1, %c0_i32, %c0_i32_0 : i32, i32, i32
  }
  func.func @transform_9(%arg0: i32, %arg1: i32) -> (i32, i32, i32) {
    %c0_i32 = arith.constant 0 : i32
    %c0_i32_0 = arith.constant 0 : i32
    %c0_i32_1 = arith.constant 0 : i32
    return %arg1, %c0_i32, %c0_i32_0 : i32, i32, i32
  }
  func.func @transform_10(%arg0: i32, %arg1: i32) -> (i32, i32, i32) {
    %c0_i32 = arith.constant 0 : i32
    %c0_i32_0 = arith.constant 0 : i32
    %c0_i32_1 = arith.constant 0 : i32
    return %arg1, %c0_i32, %c0_i32_0 : i32, i32, i32
  }
  func.func @transform_11(%arg0: i32, %arg1: i32) -> (i32, i32, i32) {
    %c0_i32 = arith.constant 0 : i32
    %c0_i32_0 = arith.constant 0 : i32
    %c0_i32_1 = arith.constant 0 : i32
    return %arg1, %c0_i32, %c0_i32_0 : i32, i32, i32
  }
  func.func @transform_12(%arg0: i32, %arg1: i32) -> (i32, i32, i32) {
    %c0_i32 = arith.constant 0 : i32
    %c0_i32_0 = arith.constant 0 : i32
    %c0_i32_1 = arith.constant 0 : i32
    return %arg1, %c0_i32, %c0_i32_0 : i32, i32, i32
  }
  func.func @transform_13(%arg0: i32, %arg1: i32) -> (i32, i32, i32) {
    %c0_i32 = arith.constant 0 : i32
    %c0_i32_0 = arith.constant 0 : i32
    %c0_i32_1 = arith.constant 0 : i32
    return %arg1, %c0_i32, %c0_i32_0 : i32, i32, i32
  }
  func.func @transform_14(%arg0: i32, %arg1: i32) -> (i32, i32, i32) {
    %c0_i32 = arith.constant 0 : i32
    %c0_i32_0 = arith.constant 0 : i32
    %c0_i32_1 = arith.constant 0 : i32
    return %arg1, %c0_i32, %c0_i32_0 : i32, i32, i32
  }
  func.func @transform_15(%arg0: i32, %arg1: i32) -> (i32, i32, i32) {
    %c0_i32 = arith.constant 0 : i32
    %c0_i32_0 = arith.constant 0 : i32
    %c0_i32_1 = arith.constant 0 : i32
    return %arg1, %c0_i32, %c0_i32_0 : i32, i32, i32
  }
  func.func @transform_16(%arg0: i32, %arg1: i32) -> (i32, i32, i32) {
    %c0_i32 = arith.constant 0 : i32
    %c0_i32_0 = arith.constant 0 : i32
    %c0_i32_1 = arith.constant 0 : i32
    return %arg1, %c0_i32, %c0_i32_0 : i32, i32, i32
  }
  func.func @transform_17(%arg0: i32, %arg1: i32) -> (i32, i32) {
    %c0_i32 = arith.constant 0 : i32
    %c0_i32_0 = arith.constant 0 : i32
    %c0_i32_1 = arith.constant 0 : i32
    return %c0_i32, %c0_i32_0 : i32, i32
  }
  func.func @transform_18(%arg0: i32, %arg1: i32) -> (i32, i32) {
    %c0_i32 = arith.constant 0 : i32
    %c0_i32_0 = arith.constant 0 : i32
    %c0_i32_1 = arith.constant 0 : i32
    return %c0_i32, %c0_i32_0 : i32, i32
  }
  func.func @transform_19(%arg0: i32, %arg1: i32) -> (i32, i32, i32) {
    %c0_i32 = arith.constant 0 : i32
    %c0_i32_0 = arith.constant 0 : i32
    %c0_i32_1 = arith.constant 0 : i32
    return %arg0, %c0_i32, %c0_i32_0 : i32, i32, i32
  }
}

</mosaic_0001>

<bundles_post_ra>
// kernel: tpu_custom_call.1
= control target key start
LH: loop header
LB: loop body
LE: loop exit
PB: predicated region body
PF: predicated region fallthrough
CT: control target
= control target key end

     0   :  { %s4562_s0 = inlined_call_operand.hbm [shape: f32[2,8,32], index: 0, kind: input, shape index: {}]   ;;  %s4563_s1 = inlined_call_operand.vmem [shape: f32[2,32,32], index: 1, kind: input, shape index: {}]   ;;  %s4564_s2 = inlined_call_operand.vmem [shape: f32[2,1,32], index: 2, kind: input, shape index: {}]   ;;  %s4565_s3 = inlined_call_operand.vmem [shape: f32[2,32,32], index: 3, kind: input, shape index: {}]   ;;  %s4566_s4 = inlined_call_operand.vmem [shape: f32[2,1,32], index: 4, kind: input, shape index: {}]   ;;  %s4567_s5 = inlined_call_operand.vmem [shape: f32[2,32,32], index: 5, kind: input, shape index: {}]   ;;  %s4568_s6 = inlined_call_operand.vmem [shape: f32[2,1,32], index: 6, kind: input, shape index: {}]   ;;  %s4569_s7 = inlined_call_operand.hbm [shape: f32[2,32,32], index: 7, kind: input, shape index: {}]   ;;  %s4570_s8 = inlined_call_operand.vmem [shape: f32[2,1,32], index: 8, kind: input, shape index: {}]   ;;  %s4571_s9 = inlined_call_operand.vmem [shape: f32[2,1,32], index: 9, kind: input, shape index: {}]   ;;  %s4572_s10 = inlined_call_operand.vmem [shape: f32[2,1,32], index: 10, kind: input, shape index: {}]   ;;  %s4573_s11 = inlined_call_operand.hbm [shape: f32[2,32,64], index: 11, kind: input, shape index: {}]   ;;  %s4574_s12 = inlined_call_operand.vmem [shape: f32[2,1,64], index: 12, kind: input, shape index: {}]   ;;  %s4575_s13 = inlined_call_operand.vmem [shape: f32[2,64,32], index: 13, kind: input, shape index: {}]   ;;  %s4576_s14 = inlined_call_operand.vmem [shape: f32[2,1,32], index: 14, kind: input, shape index: {}]   ;;  %s4577_s15 = inlined_call_operand.vmem [shape: f32[2,1,32], index: 15, kind: input, shape index: {}]   ;;  %s4578_s16 = inlined_call_operand.vmem [shape: f32[2,1,32], index: 16, kind: input, shape index: {}]   ;;  %s4579_s17 = inlined_call_operand.vmem [shape: f32[1,32], index: 17, kind: input, shape index: {}]   ;;  %s4580_s18 = inlined_call_operand.vmem [shape: f32[1,32], index: 18, kind: input, shape index: {}]   ;;  %s4581_s19 = inlined_call_operand.hbm [shape: f32[2,8,32], index: 19, kind: output, shape index: {}]  }
   0x1   :  { %4598 = sst [smem:[#allocation21_spill]] %s4562_s0 }
   0x2   :  { %4599 = sst [smem:[#allocation22_spill]] %s4563_s1 }
   0x3   :  { %4600 = sst [smem:[#allocation23_spill]] %s4564_s2 }
   0x4   :  { %4601 = sst [smem:[#allocation24_spill]] %s4565_s3 }
   0x5   :  { %4602 = sst [smem:[#allocation25_spill]] %s4567_s5 }
   0x6   :  { %4603 = sst [smem:[#allocation26_spill]] %s4569_s7 }
   0x7   :  { %4604 = sst [smem:[#allocation27_spill]] %s4572_s10 }
   0x8   :  { %4605 = sst [smem:[#allocation28_spill]] %s4573_s11 }
   0x9   :  { %4606 = sst [smem:[#allocation29_spill]] %s4577_s15 }
   0xa   :  { %4607 = sst [smem:[#allocation30_spill]] %s4578_s16 }
   0xb   :  { %4608 = sst [smem:[#allocation31_spill]] %s4579_s17 }
   0xc   :  { %4609 = sst [smem:[#allocation32_spill]] %s4580_s18 }
   0xd   :  { %4610 = sst [smem:[#allocation33_spill]] %s4581_s19 }
   0xe   :  { %24 = vsyncpa [#allocation4], 0 }
   0xf   :  { %25 = vsyncpa [#allocation7], 0 }
  0x10   :  { %27 = vsyncpa [#allocation7 + $0x1], 0 }
  0x11   :  { %28 = vsyncpa [#allocation5], 0  ;;  %s4000_s0 = smov 0   ;;  %s4002_s30 = smov 0  }
  0x12   :  { %s4004_s20 = smov 0   ;;  %s4006_s21 = smov 0  }
  0x13   :  { %s4008_s1 = smov 0   ;;  %s4010_s22 = smov 0  }
  0x14 LB: > { %4611 = sst [smem:[#allocation13_spill]] %s3867_s30  ;;  %s43_s2 = sadd.s32 1, %s3879_s1  ;;  %s3883_s22 = sphi %s4010_s22, %s34_s22   ;;  %s3879_s1 = sphi %s4008_s1, %s4661_s1   ;;  %s3875_s21 = sphi %s4006_s21, %s4660_s21   ;;  %s3871_s20 = sphi %s4004_s20, %s4659_s20   ;;  %s3867_s30 = sphi %s4002_s30, %s4658_s30   ;;  %s3863_s0 = sphi %s4000_s0, %s4657_s0  }
  0x15   : > { %4612 = sst [smem:[#allocation14_spill]] %s3871_s20  ;;  %s235_s23 = sadd.s32 1, %s3871_s20 }
  0x16   : > { %4613 = sst [smem:[#allocation15_spill]] %s3879_s1  ;;  %p44_p0 = scmp.ge.s32.totalorder %s43_s2, 2 }
  0x17   : > { %4614 = sst [smem:[#allocation16_spill]] %s3883_s22  ;;  %p242_p1 = scmp.ne.s32.totalorder %s3871_s20, %s3867_s30 }
  0x18   : > { %p243_p2 = scmp.eq.s32.totalorder %s3883_s22, 0  ;;  %s4663_s2 = smov (%p44_p0, %s43_s2), 0 }
  0x19   : > { %4615 = sst [smem:[#allocation17_spill]] %s4663_s2  ;;  %s232_s25 = ssub.s32 %s3879_s1, %s4663_s2 }
  0x1a   : > { %p4037_p3 = por %p243_p2, %p242_p1  ;;  %p233_p4 = scmp.eq.s32.totalorder %s232_s25, 0 }
  0x1b   : > { %p3602_p5 = scmp.lt.s32.totalorder %s3883_s22, 2  ;;  %s638_s3 = sand.u32 1, %s3883_s22  }
  0x1c   : > { %s640_s26 = sand.u32 1, %s3871_s20   ;;  %s3290_s29 = sshll.u32 %s3879_s1, 9 }
  0x1d   : > { %s4047_s27 = scalar_select %p233_p4, %s3871_s20, %s235_s23  }
  0x1e   : > { %s3218_s28 = sshll.u32 %s640_s26, 5  ;;  %s4618_s7 = sld [smem:[#allocation26_spill]] }
  0x1f   : > { %4617 = sst [smem:[#allocation18_spill]] %s4047_s27  ;;  %s642_s16 = scalar_lea.vmem [#allocation6], %s3218_s28 }
  0x20   : > { %s649_s15 = sshll.u32 %s642_s16, 4  ;;  %p4059_p6 = pnand %p3602_p5, %p4037_p3  ;;  %s4055_s15 = int_to_ptr.vmem [resolvable:$true] %s649_s15 }
  0x21   : > { %s4620_s11 = sld [smem:[#allocation28_spill]]  ;;  %s681_s19 = scalar_lea.vmem [#allocation8], %s3218_s28 }
  0x22   : > { %s4068_s2 = sshll.u32 %s681_s19, 4  ;;  %s4070_s1 = scalar_lea.sflag [#allocation7], %s638_s3  ;;  %s4102_s2 = int_to_ptr.vmem [resolvable:$true] %s4068_s2 }
  0x23   : > { %p3713_p8 = pneg %p4059_p6 }
  0x24   : > { %s4053_s17 = scalar_lea.hbm %s4618_s7, %s3290_s29  ;;  %s3716_s23 = scalar_lea.hbm %s4618_s7, 1024 }
  0x25   : > { %s3711_s16 = scalar_lea.hbm %s4053_s17, 512  ;;  %p3717_p11 = scmp.lt.u32.totalorder %s4053_s17, %s4618_s7 }
  0x26   : > { %p3712_p7 = scmp.ne.s32.totalorder %s4053_s17, %s3711_s16  ;;  %p3718_p12 = scmp.lt.u32.totalorder %s3716_s23, %s3711_s16 }
  0x27   : > { %s4066_s18 = scalar_lea.hbm %s4620_s11, %s3290_s29  ;;  %p3720_p0 = scmp.lt.u32.totalorder %s3711_s16, %s4053_s17 }
  0x28   : > { %p3714_p9 = pnand %p3713_p8, %p3712_p7  ;;  %p3719_p13 = por %p3718_p12, %p3717_p11 }
  0x2a   : > { %p3715_p10 = pneg %p3714_p9  ;;  %p3721_p1 = por %p3720_p0, %p3719_p13 }
  0x2c   : > { %p3722_p2 = pnand %p3721_p1, %p3715_p10 }
  0x2e   : > { %3725 = shalt.err (!%p3722_p2)
}
  0x2f   : > { %s3726_s3 = scalar_lea.vmem %s4055_s15, 512  ;;  %s3885_s27 = smov [#allocation6]  }
  0x30   : > { %p3727_p3 = scmp.ne.s32.totalorder %s4055_s15, %s3726_s3  ;;  %s3731_s28 = sshll.u32 %s3885_s27, 4  ;;  %s3732_s28 = int_to_ptr.vmem [resolvable:$false] %s3731_s28 }
  0x31   : > { %s3733_s19 = scalar_lea.vmem %s3732_s28, 1024  ;;  %p3734_p7 = scmp.lt.s32.totalorder %s4055_s15, %s3732_s28 }
  0x32   : > { %p3729_p4 = pnand %p3727_p3, %p3713_p8  ;;  %p3735_p9 = scmp.lt.s32.totalorder %s3733_s19, %s3726_s3 }
  0x34   : > { %p3730_p5 = pneg %p3729_p4  ;;  %p3736_p11 = por %p3735_p9, %p3734_p7 }
  0x36   : > { %p3737_p12 = pnand %p3736_p11, %p3730_p5 }
  0x38   : > { %3740 = shalt.err (!%p3737_p12)
}
  0x39   : > { %s4586_s16 = smov 128   ;;  %s3887_s24 = smov 8  }
  0x3a   : > { %3597 = dma.hbm_to_vmem [thread:$0]  (!%p4059_p6), %s4053_s17, 512, %s4055_s15, %s4070_s1, %s4586_s16, %s4586_s16, %s3887_s24  }
  0x3b   : > { %s4105_s23 = sadd.s32 4294967295, %s3883_s22   ;;  %p248_p10 = scmp.ne.s32.totalorder %s3867_s30, %s3863_s0 }
  0x3c   : > { %4621 = sst [smem:[#allocation19_spill]] %s4105_s23  ;;  %p4588_p13 = scmp.eq.s32.totalorder %s4105_s23, 0 }
  0x3d   : > { %p3215_p0 = scmp.ge.s32.totalorder %s3883_s22, 1  ;;  %p561_p1 = scmp.lt.s32.totalorder %s3883_s22, 3 }
  0x3e   : > { %p4114_p2 = por %p4588_p13, %p248_p10  ;;  %s3888_s15 = smov [#allocation3]  }
  0x3f   : > { %p4118_p3 = pnand %p3215_p0, %p561_p1  ;;  %s4122_s17 = sshll.u32 %s3888_s15, 4  ;;  %s577_s17 = int_to_ptr.vmem [resolvable:$true] %s4122_s17 }
  0x40   : > { %s4622_s26 = scalar_select %p4114_p2, 1, 0 }
  0x41   : > { %s4623_s29 = scalar_select %p4118_p3, 1, 0 }
  0x42   : > { %s3741_s0 = scalar_lea.hbm %s4066_s18, 512  ;;  %s3746_s28 = scalar_lea.hbm %s4620_s11, 1024 }
  0x43   : > { %p3742_p5 = scmp.ne.s32.totalorder %s4066_s18, %s3741_s0  ;;  %p3747_p11 = scmp.lt.u32.totalorder %s4066_s18, %s4620_s11 }
  0x44   : > { %p3748_p12 = scmp.lt.u32.totalorder %s3746_s28, %s3741_s0  ;;  %p3750_p0 = scmp.lt.u32.totalorder %s3741_s0, %s4066_s18 }
  0x45   : > { %p3744_p7 = pnand %p3742_p5, %p3713_p8 }
  0x46   : > { %p3749_p10 = por %p3748_p12, %p3747_p11 }
  0x47   : > { %p3745_p9 = pneg %p3744_p7 }
  0x48   : > { %p3751_p1 = por %p3750_p0, %p3749_p10 }
  0x4a   : > { %p3752_p13 = pnand %p3751_p1, %p3745_p9 }
  0x4c   : > { %3755 = shalt.err (!%p3752_p13)
}
  0x4d   : > { %s3756_s15 = scalar_lea.vmem %s4102_s2, 512  ;;  %s3889_s3 = smov [#allocation8]  }
  0x4e   : > { %p3757_p5 = scmp.ne.s32.totalorder %s4102_s2, %s3756_s15  ;;  %s3761_s27 = sshll.u32 %s3889_s3, 4  ;;  %s3762_s27 = int_to_ptr.vmem [resolvable:$false] %s3761_s27 }
  0x4f   : > { %s3763_s16 = scalar_lea.vmem %s3762_s27, 1024  ;;  %p3764_p2 = scmp.lt.s32.totalorder %s4102_s2, %s3762_s27 }
  0x50   : > { %p3759_p7 = pnand %p3757_p5, %p3713_p8  ;;  %p3765_p11 = scmp.lt.s32.totalorder %s3763_s16, %s3756_s15 }
  0x52   : > { %p3760_p4 = pneg %p3759_p7  ;;  %p3766_p12 = por %p3765_p11, %p3764_p2 }
  0x54   : > { %p3767_p10 = pnand %p3766_p12, %p3760_p4 }
  0x56   : > { %3770 = shalt.err (!%p3767_p10)
}
  0x57   : > { %s4624_s0 = smov 128   ;;  %p4625_p8 = scmp.eq.s32.totalorder %s4105_s23, 0 }
  0x58   : > { %3600 = dma.hbm_to_vmem [thread:$0]  (!%p4059_p6), %s4066_s18, 512, %s4102_s2, %s4070_s1, %s4624_s0, %s4624_s0, %s3887_s24  }
  0x59   : > { %p4626_p13 = pneg %p4118_p3  ;;  %s4628_s15 = sld [smem:[#allocation21_spill]] }
  0x5b   : > { %p4159_p9 = pnand %p4626_p13, %p4625_p8 }
  0x5d   : > { %p3773_p4 = pneg %p4159_p9 }
  0x5f   : > { %s3771_s3 = scalar_lea.hbm %s4628_s15, 256 }
  0x60   : > { %p3772_p2 = scmp.ne.s32.totalorder %s4628_s15, %s3771_s3  ;;  %p3778_p1 = scmp.lt.u32.totalorder %s3771_s3, %s4628_s15 }
  0x62   : > { %p3774_p6 = pnand %p3773_p4, %p3772_p2 }
  0x64   : > { %p3775_p0 = pneg %p3774_p6 }
  0x66   : > { %p3780_p5 = pnand %p3778_p1, %p3775_p0 }
  0x68   : > { %3783 = shalt.err (!%p3780_p5)
}
  0x69   : > { %s3784_s18 = scalar_lea.vmem %s577_s17, 256  ;;  %p3792_p10 = scmp.lt.s32.totalorder %s577_s17, %s577_s17 }
  0x6a   : > { %p3785_p7 = scmp.ne.s32.totalorder %s577_s17, %s3784_s18  ;;  %p3793_p8 = scmp.lt.s32.totalorder %s3784_s18, %s3784_s18 }
  0x6c   : > { %p3787_p11 = pnand %p3785_p7, %p3773_p4  ;;  %p3794_p13 = por %p3793_p8, %p3792_p10 }
  0x6e   : > { %p3788_p12 = pneg %p3787_p11 }
  0x70   : > { %p3795_p3 = pnand %p3794_p13, %p3788_p12 }
  0x72   : > { %3798 = shalt.err (!%p3795_p3)
}
  0x73   : > { %3593 = dma.hbm_to_vmem [thread:$0]  (!%p4159_p9), %s4628_s15, 256, %s577_s17, [#allocation4], %s4624_s0, %s4624_s0, %s3887_s24  }
  0x74   : > { %p4629_p2 = scmp.ne.s32.totalorder %s4623_s29, 0 }
  0x76   : > { %732 = sbr.rel (%p4629_p2) target bundleno = 3070 (0xbfe), region = 96 }
  0x7d   : > { %p4630_p4 = scmp.eq.s32.totalorder %s4105_s23, 0 }
  0x7f   : > { %3850 = dma.done.wait (%p4630_p4), [#allocation4], 256   ;;  %p4631_p6 = pmov %p4630_p4 }
  0x80   : > { %s738_s28 = sand.u32 1, %s4105_s23   ;;  %s740_s3 = sand.u32 1, %s3867_s30  }
  0x81   : > { %3852 = vsyncadd (%p4631_p6), [#allocation4], 4294967040  ;;  %s3226_s27 = sshll.u32 %s740_s3, 5  ;;  %s739_s16 = scalar_lea.sflag [#allocation7], %s738_s28 }
  0x82   : > { %s4190_s1 = scalar_lea.vmem [#allocation6], %s3226_s27  ;;  %p4633_p3 = scmp.ne.s32.totalorder %s4622_s26, 0 }
  0x83   : > { %4632 = sst [smem:[#allocation20_spill]] %s4190_s1 }
  0x84   : > { %3854 = dma.done.wait (%p4633_p3), %s739_s16, 1024  }
  0x85   : > { %3856 = vsyncadd (%p4633_p3), %s739_s16, 4294966272  ;;  %p857_p9 = scmp.lt.s32.totalorder %s3875_s21, 1  ;;  %s4635_s25 = sld [smem:[#allocation22_spill]] }
  0x86   : > { %s4636_s7 = sld [smem:[#allocation24_spill]]  ;;  %s4637_s5 = sld [smem:[#allocation25_spill]] }
  0x87   : > { %s4198_s24 = scalar_select %p857_p9, %s3875_s21, 1 }
  0x88   : > { %s4639_s16 = sld [smem:[#allocation29_spill]]  ;;  %s4640_s15 = sld [smem:[#allocation30_spill]] }
  0x89   : > { %s3292_s29 = sshll.u32 %s4198_s24, 5  ;;  %s892_s23 = scalar_lea.vmem %s4574_s12, %s4198_s24 }
  0x8a   : > { %s4260_s30 = scalar_lea.vmem [#allocation8], %s3226_s27  ;;  %p3236_p0 = scmp.ne.s32.totalorder %s3875_s21, 0 }
  0x8b   : > { %s861_s28 = scalar_lea.vmem %s4635_s25, %s3292_s29  ;;  %s900_s25 = scalar_lea.vmem %s4576_s14, %s4198_s24  ;;  %v912_v0 = vld [vmem:[#allocation3] sm:$0xff] (!%p3236_p0)  ;;  %vm913_vm0 = vcmask (!%p3236_p0), 261120   ;;  %v916_v1 = vld [vmem:[#allocation3 + $0x8] sm:$0xff] (!%p3236_p0) }
  0x8c   : > { %s4211_s11 = scalar_lea.vmem %s4636_s7, %s3292_s29  ;;  %s4220_s1 = scalar_lea.vmem %s4637_s5, %s3292_s29  ;;  %914 = vst.msk [vmem:[#allocation2] sm:$0xff] (!%p3236_p0), %vm913_vm0, %v912_v0  ;;  %917 = vst.msk [vmem:[#allocation2 + $0x8] sm:$0xff] (!%p3236_p0), %vm913_vm0, %v916_v1 }
  0x8d   : > { %s3295_s29 = sshll.u32 %s4198_s24, 6  ;;  %911 = sbr.rel (%p3236_p0) target bundleno = 148 (0x94), region = 112 }
  0x8e   : > { %s4246_s17 = scalar_lea.vmem %s4575_s13, %s3295_s29  ;;  %s903_s0 = scalar_lea.vmem %s4639_s16, %s4198_s24 }
  0x8f   : > { %s906_s10 = scalar_lea.vmem %s4640_s15, %s4198_s24 }
  0x94 PF: > { %v920_v2 = vld [vmem:[%s861_s28] sm:$0xff]  ;;  %v921_v3 = vld [vmem:[%s861_s28 + $0x8] sm:$0xff]  ;;  %v922_v4 = vld [vmem:[%s861_s28 + $0x10] sm:$0xff]  ;;  %vm931_vm1 = vcmask 261120   ;;  %v3890_v16 = vmov 0.0   ;;  %vm3891_vm2 = vmmov 0   ;;  %s4641_s27 = scalar_lea.vmem %s4566_s4, %s4198_s24  ;;  %s4644_s3 = scalar_lea.vmem %s4568_s6, %s4198_s24 }
  0x95   : > { %v3522_v5 = vpack.c.bf16 %v921_v3, %v920_v2  ;;  %v923_v6 = vld [vmem:[%s861_s28 + $0x18] sm:$0xff]  ;;  %v4263_v7 = vld [vmem:[#allocation2] sm:$0xff]  ;;  %v1014_v10 = vld [vmem:[%s4211_s11 + $0x8] sm:$0xff]  ;;  %vm1185_vm3 = vcmask 64512   ;;  %s4642_s16 = sld [smem:[#allocation23_spill]]  ;;  %s3892_s22 = smov 112  }
  0x96   : > { %v3526_v8 = vpack.c.bf16 %v923_v6, %v922_v4  ;;  %3376 = vmatprep.mubr.msk.f32.mxu1 %vm931_vm1, %v4263_v7  ;;  %v1013_v9 = vld [vmem:[%s4211_s11] sm:$0xff]  ;;  %3398 = vmatprep.mubr.msk.f32.mxu0 %vm931_vm1, %v4263_v7  ;;  %v1015_v12 = vld [vmem:[%s4211_s11 + $0x10] sm:$0xff]  ;;  %v1016_v13 = vld [vmem:[%s4211_s11 + $0x18] sm:$0xff]  ;;  %s3893_s29 = smov 120   ;;  %s3894_s26 = smov 104   ;;  %vm1859_vm4 = vcmask 130048  }
  0x97   : > { %3523 = vmatprep.subr.bf16.mxu1 %v3522_v5  ;;  %v3530_v11 = vpack.c.bf16 %v1014_v10, %v1013_v9  ;;  %v4273_v14 = vld [vmem:[#allocation2 + $0x8] sm:$0xff]  ;;  %v3534_v15 = vpack.c.bf16 %v1016_v13, %v1015_v12  ;;  %v1099_v17 = vld [vmem:[%s4220_s1] sm:$0xff]  ;;  %v1101_v19 = vld [vmem:[%s4220_s1 + $0x10] sm:$0xff]  ;;  %s4645_s7 = sld [smem:[#allocation20_spill]]  ;;  %s3895_s2 = smov 8   ;;  %vm1861_vm5 = vcmask 195584  }
  0x98   : > { %3525 = vmatpush3.bf16.msra.mxu1 %v3522_v5  ;;  %v1100_v18 = vld [vmem:[%s4220_s1 + $0x8] sm:$0xff]  ;;  %v1102_v21 = vld [vmem:[%s4220_s1 + $0x18] sm:$0xff]  ;;  %v3240_v25 = vld [vmem:[%s4641_s27] ss:$0 sm:$0xff]  ;;  %s3896_s20 = smov 16   ;;  %s3897_s5 = smov 24  }
  0x99   : > { %3527 = vmatprep.subr.bf16.mxu1 %v3526_v8  ;;  %v3538_v20 = vpack.c.bf16 %v1100_v18, %v1099_v17  ;;  %v3542_v22 = vpack.c.bf16 %v1102_v21, %v1101_v19  ;;  %v3243_v33 = vld [vmem:[%s4644_s3] ss:$0 sm:$0xff]  ;;  %s4646_s1 = scalar_lea.vmem %s4570_s8, %s4198_s24  ;;  %vm2786_vm6 = vcmask 523264   ;;  %p3283_p1 = scmp.ne.s32.totalorder %s3875_s21, 1 }
  0x9b   : > { %3539 = vmatprep.subr.bf16.mxu0 %v3538_v20  ;;  %s4643_s15 = scalar_lea.vmem %s4642_s16, %s4198_s24  ;;  %s4647_s16 = scalar_lea.vmem %s4571_s9, %s4198_s24 }
  0x9c   : > { %3529 = vmatpush3.bf16.msra.mxu1 %v3526_v8  ;;  %3541 = vmatpush3.bf16.msra.mxu0 %v3538_v20  ;;  %v3237_v29 = vld [vmem:[%s4643_s15] ss:$0 sm:$0xff] }
  0x9d   : > { %3531 = vmatprep.subr.bf16.mxu1 %v3530_v11  ;;  %3543 = vmatprep.subr.bf16.mxu0 %v3542_v22 }
  0x9f   : > { %3377 = vmatmul.mubr.msk.f32.vlgmr.msra.gmra.mrb[0].mxu1 %vm931_vm1, %v4273_v14 }
  0xa0   : > { %3533 = vmatpush3.bf16.msra.mxu1 %v3530_v11  ;;  %3387 = vmatprep.mubr.msk.f32.mxu1 %vm931_vm1, %v4263_v7 }
  0xa1   : > { %3535 = vmatprep.subr.bf16.mxu1 %v3534_v15  ;;  %3545 = vmatpush3.bf16.msra.mxu0 %v3542_v22 }
  0xa2   : > { %3411 = vmatprep.subr.mxu0 %v3890_v16 }
  0xa4   : > { %3537 = vmatpush3.bf16.msra.mxu1 %v3534_v15  ;;  %3399 = vmatmul.mubr.msk.f32.vlgmr.msra.gmra.mrb[0].mxu0 %vm931_vm1, %v4273_v14 }
  0xa5   : > { %3401 = vmatprep.subr.mxu1 %v3890_v16  ;;  %3413 = vmatprep.mubr.msk.f32.mxu0 %vm3891_vm2, %v3890_v16 }
  0xa7   : > { %3388 = vmatmul.mubr.msk.f32.vlgmr.msra.gmra.mrb[2].mxu1 %vm931_vm1, %v4273_v14 }
  0xa8   : > { %3403 = vmatprep.mubr.msk.f32.mxu1 %vm3891_vm2, %v3890_v16 }
 0x172   : > { %v3378_v23 = vpop.f32.mrb[0].mxu1 }
 0x173   : > { %v1004_v24 = vpop.f32.mrb[1].mxu1  ;;  %v1010_v31 = vadd.f32 %v3378_v23, %v3237_v29 }
 0x174   : > { %v1005_v30 = vadd.f32 %v3237_v29, %v1004_v24 }
 0x177   : > { %v3400_v36 = vpop.f32.mrb[0].mxu0 }
 0x178   : > { %v4327_v37 = vadd.f32 %v3400_v36, %v3243_v33  ;;  %v1176_v38 = vpop.f32.mrb[1].mxu0 }
 0x179   : > { %v4329_v39 = vadd.f32 %v3243_v33, %v1176_v38 }
 0x17a   : > { %v3389_v26 = vpop.f32.mrb[2].mxu1 }
 0x17b   : > { %v1090_v27 = vpop.f32.mrb[3].mxu1  ;;  %v1096_v32 = vadd.f32 %v3389_v26, %v3240_v25 }
 0x17c   : > { %v1091_v28 = vadd.f32 %v3240_v25, %v1090_v27 }
 0x17e   : > { %1516 = vrot.lane.b32.xlu1 %v1091_v28, %s3892_s22  ;;  %1349 = vrot.lane.b32.xlu0 %v1091_v28, %s3893_s29 }
 0x17f   : > { %3402 = vmatpush3.xpose.msk.msra.mxu1 %vm1185_vm3, %v1091_v28 }
 0x180   : > { %3406 = vmatprep.subr.mxu1 %v3890_v16 }
 0x182   : > { %3404 = vmatmul.mubr.msk.f32.vlgmr.msra.gmra.mrb[4].mxu1 %vm1185_vm3, %v1005_v30  ;;  %1514 = vrot.lane.b32.xlu1 %v1005_v30, %s3892_s22 }
 0x183   : > { %1347 = vrot.lane.b32.xlu0 %v1005_v30, %s3893_s29  ;;  %3408 = vmatprep.mubr.msk.f32.mxu1 %vm3891_vm2, %v3890_v16 }
 0x184   : > { %3407 = vmatpush3.msra.mxu1 %v4329_v39 }
 0x185   : > { %3416 = vmatprep.subr.mxu1 %v3890_v16 }
 0x186   : > { %1680 = vrot.lane.b32.xlu1 %v1005_v30, %s3894_s26 }
 0x187   : > { %1682 = vrot.lane.b32.xlu0 %v1091_v28, %s3894_s26 }
 0x18a   : > { %2024 = vrot.lane.b32.xlu1 %v1010_v31, %s3893_s29 }
 0x18b   : > { %2026 = vrot.lane.b32.xlu0 %v1096_v32, %s3893_s29 }
 0x18e   : > { %2191 = vrot.lane.b32.xlu1 %v1010_v31, %s3892_s22 }
 0x18f   : > { %2193 = vrot.lane.b32.xlu0 %v1096_v32, %s3892_s22 }
 0x192   : > { %2357 = vrot.lane.b32.xlu1 %v1010_v31, %s3894_s26 }
 0x193   : > { %2359 = vrot.lane.b32.xlu0 %v1096_v32, %s3894_s26 }
 0x1f0   : > { %v1517_v34 = vpop.permute.xlu1 %1516  ;;  %v1350_v35 = vpop.permute.xlu0 %1349 }
 0x1f1   : > { %3412 = vmatpush3.xpose.msk.msra.mxu0 %vm1185_vm3, %v1350_v35 }
 0x1f2   : > { %3421 = vmatprep.subr.mxu0 %v3890_v16 }
 0x1f4   : > { %v1515_v40 = vpop.permute.xlu1 %1514 }
 0x1f5   : > { %v1348_v41 = vpop.permute.xlu0 %1347 }
 0x1f6   : > { %3414 = vmatmul.mubr.msk.f32.vlgmr.msra.gmra.mrb[2].mxu0 %vm1185_vm3, %v1348_v41 }
 0x1f7   : > { %3422 = vmatpush3.xpose.msk.msra.mxu0 %vm1185_vm3, %v1517_v34  ;;  %3423 = vmatprep.mubr.msk.f32.mxu0 %vm3891_vm2, %v3890_v16 }
 0x1f8   : > { %3431 = vmatprep.subr.mxu0 %v3890_v16  ;;  %v1681_v43 = vpop.permute.xlu1 %1680 }
 0x1f9   : > { %v1683_v42 = vpop.permute.xlu0 %1682 }
 0x1fa   : > { %3424 = vmatmul.mubr.msk.f32.vlgmr.msra.gmra.mrb[4].mxu0 %vm1185_vm3, %v1515_v40 }
 0x1fb   : > { %3432 = vmatpush3.xpose.msk.msra.mxu0 %vm1185_vm3, %v1683_v42  ;;  %3433 = vmatprep.mubr.msk.f32.mxu0 %vm3891_vm2, %v3890_v16 }
 0x1fc   : > { %3441 = vmatprep.subr.mxu0 %v3890_v16  ;;  %v2025_v45 = vpop.permute.xlu1 %2024 }
 0x1fd   : > { %v2027_v44 = vpop.permute.xlu0 %2026 }
 0x1fe   : > { %3434 = vmatmul.mubr.msk.f32.vlgmr.msra.gmra.mrb[6].mxu0 %vm1185_vm3, %v1681_v43 }
 0x1ff   : > { %3442 = vmatpush3.xpose.msk.msra.mxu0 %vm1185_vm3, %v1096_v32  ;;  %3443 = vmatprep.mubr.msk.f32.mxu0 %vm3891_vm2, %v3890_v16 }
 0x200   : > { %3451 = vmatprep.subr.mxu0 %v3890_v16  ;;  %v2192_v47 = vpop.permute.xlu1 %2191 }
 0x201   : > { %v2194_v46 = vpop.permute.xlu0 %2193 }
 0x202   : > { %3444 = vmatmul.mubr.msk.f32.vlgmr.msra.gmra.mrb[8].mxu0 %vm1185_vm3, %v1010_v31 }
 0x203   : > { %3452 = vmatpush3.xpose.msk.msra.mxu0 %vm1185_vm3, %v2027_v44  ;;  %3453 = vmatprep.mubr.msk.f32.mxu0 %vm3891_vm2, %v3890_v16 }
 0x204   : > { %3461 = vmatprep.subr.mxu0 %v3890_v16  ;;  %v2358_v49 = vpop.permute.xlu1 %2357 }
 0x205   : > { %v2360_v48 = vpop.permute.xlu0 %2359 }
 0x206   : > { %3454 = vmatmul.mubr.msk.f32.vlgmr.msra.gmra.mrb[10].mxu0 %vm1185_vm3, %v2025_v45 }
 0x207   : > { %3462 = vmatpush3.xpose.msk.msra.mxu0 %vm1185_vm3, %v2194_v46  ;;  %3463 = vmatprep.mubr.msk.f32.mxu0 %vm3891_vm2, %v3890_v16 }
 0x208   : > { %3471 = vmatprep.subr.mxu0 %v3890_v16 }
 0x20a   : > { %3464 = vmatmul.mubr.msk.f32.vlgmr.msra.gmra.mrb[12].mxu0 %vm1185_vm3, %v2192_v47 }
 0x20b   : > { %3472 = vmatpush3.xpose.msk.msra.mxu0 %vm1185_vm3, %v2360_v48  ;;  %3473 = vmatprep.mubr.msk.f32.mxu0 %vm3891_vm2, %v3890_v16 }
 0x20e   : > { %3474 = vmatmul.mubr.msk.f32.vlgmr.msra.gmra.mrb[14].mxu0 %vm1185_vm3, %v2358_v49 }
 0x255   : > { %v1258_v50 = vpop.f32.mrb[4].mxu1 }
 0x256   : > { %v1262_v51 = vmul.f32 0.35355338, %v1258_v50  ;;  %v3405_v52 = vpop.f32.mrb[5].mxu1 }
 0x258   : > { %v1263_v53 = vsel %vm1185_vm3, %v1262_v51, -inf }
 0x259   : > { %1264 = vmax.xlane.f32.xlu0 %v1263_v53 }
 0x2c9   : > { %v1421_v54 = vpop.f32.mrb[2].mxu0 }
 0x2ca   : > { %v1425_v55 = vmul.f32 0.35355338, %v1421_v54  ;;  %v3415_v56 = vpop.f32.mrb[3].mxu0 }
 0x2cc   : > { %v1426_v57 = vsel %vm1185_vm3, %v1425_v55, -inf }
 0x2cd   : > { %1427 = vmax.xlane.f32.xlu1 %v1426_v57  ;;  %v1588_v58 = vpop.f32.mrb[4].mxu0 }
 0x2ce   : > { %v1592_v59 = vmul.f32 0.35355338, %v1588_v58  ;;  %v3425_v60 = vpop.f32.mrb[5].mxu0 }
 0x2d0   : > { %v1593_v61 = vsel %vm1185_vm3, %v1592_v59, -inf }
 0x2d1   : > { %v1754_v62 = vpop.f32.mrb[6].mxu0  ;;  %1594 = vmax.xlane.f32.xlu0 %v1593_v61 }
 0x2d2   : > { %v1758_v63 = vmul.f32 0.35355338, %v1754_v62  ;;  %v3435_v0 = vpop.f32.mrb[7].mxu0 }
 0x2d4   : > { %v1759_v1 = vsel %vm1185_vm3, %v1758_v63, -inf }
 0x2d5   : > { %v1935_v2 = vpop.f32.mrb[8].mxu0  ;;  %1760 = vmax.xlane.f32.xlu0 %v1759_v1 }
 0x2d6   : > { %v1939_v3 = vmul.f32 0.35355338, %v1935_v2  ;;  %v3445_v4 = vpop.f32.mrb[9].mxu0 }
 0x2d8   : > { %v1940_v5 = vsel %vm1185_vm3, %v1939_v3, -inf }
 0x2d9   : > { %1941 = vmax.xlane.f32.xlu1 %v1940_v5  ;;  %v2098_v6 = vpop.f32.mrb[10].mxu0 }
 0x2da   : > { %v2102_v8 = vmul.f32 0.35355338, %v2098_v6  ;;  %v3455_v9 = vpop.f32.mrb[11].mxu0 }
 0x2dc   : > { %v2103_v10 = vsel %vm1185_vm3, %v2102_v8, -inf }
 0x2dd   : > { %v2265_v11 = vpop.f32.mrb[12].mxu0  ;;  %2104 = vmax.xlane.f32.xlu0 %v2103_v10 }
 0x2de   : > { %v2269_v12 = vmul.f32 0.35355338, %v2265_v11  ;;  %v3465_v13 = vpop.f32.mrb[13].mxu0 }
 0x2e0   : > { %v2270_v15 = vsel %vm1185_vm3, %v2269_v12, -inf }
 0x2e1   : > { %2271 = vmax.xlane.f32.xlu1 %v2270_v15  ;;  %v2431_v17 = vpop.f32.mrb[14].mxu0 }
 0x2e2   : > { %v2435_v18 = vmul.f32 0.35355338, %v2431_v17  ;;  %v3475_v19 = vpop.f32.mrb[15].mxu0 }
 0x2e4   : > { %v2436_v20 = vsel %vm1185_vm3, %v2435_v18, -inf }
 0x2e5   : > { %2437 = vmax.xlane.f32.xlu0 %v2436_v20 }
 0x2e6   : > { %v1265_v21 = vpop.xlane.xlu0 %1264 }
 0x2e7   : > { %v1266_v22 = vsub.f32 %v1262_v51, %v1265_v21 }
 0x2e9   : > { %v1267_v23 = vmul.f32 1.442695, %v1266_v22 }
 0x2eb   : > { %3667 = vpow2.f32 %v1267_v23 }
 0x2f2   : > { %1438 = vrot.lane.b32.xlu1 %v4329_v39, %s3893_s29 }
 0x2f5   : > { %v3668_v24 = vpop.eup %3667 }
 0x2f6   : > { %v1269_v25 = vsel %vm1185_vm3, %v3668_v24, 0.0 }
 0x316   : > { %1270 = vadd.xlane.f32.xlu1 %v1269_v25 }
 0x327   : > { %1770 = vrot.lane.b32.xlu1 %v4329_v39, %s3894_s26 }
 0x35a   : > { %v1428_v26 = vpop.xlane.xlu1 %1427 }
 0x35b   : > { %v1429_v27 = vsub.f32 %v1425_v55, %v1428_v26 }
 0x35d   : > { %v1430_v28 = vmul.f32 1.442695, %v1429_v27 }
 0x35e   : > { %v1595_v29 = vpop.xlane.xlu0 %1594 }
 0x35f   : > { %3669 = vpow2.f32 %v1430_v28  ;;  %v1596_v30 = vsub.f32 %v1592_v59, %v1595_v29 }
 0x361   : > { %v1597_v31 = vmul.f32 1.442695, %v1596_v30 }
 0x362   : > { %v1761_v36 = vpop.xlane.xlu0 %1760 }
 0x363   : > { %3671 = vpow2.f32 %v1597_v31  ;;  %v1762_v38 = vsub.f32 %v1758_v63, %v1761_v36  ;;  %v2538_v36 = vld [vmem:[%s4645_s7] sm:$0xff] }
 0x365   : > { %v1763_v43 = vmul.f32 1.442695, %v1762_v38  ;;  %v2539_v38 = vld [vmem:[%s4645_s7 + $0x8] sm:$0xff] }
 0x366   : > { %v1942_v40 = vpop.xlane.xlu1 %1941 }
 0x367   : > { %v1943_v42 = vsub.f32 %v1939_v3, %v1942_v40  ;;  %3673 = vpow2.f32 %v1763_v43  ;;  %v2540_v40 = vld [vmem:[%s4645_s7 + $0x10] sm:$0xff] }
 0x369   : > { %v3670_v32 = vpop.eup %3669  ;;  %v1944_v47 = vmul.f32 1.442695, %v1943_v42 }
 0x36a   : > { %v1432_v33 = vsel %vm1185_vm3, %v3670_v32, 0.0  ;;  %v2105_v41 = vpop.xlane.xlu0 %2104 }
 0x36b   : > { %1433 = vadd.xlane.f32.xlu0 %v1432_v33  ;;  %v2106_v44 = vsub.f32 %v2102_v8, %v2105_v41  ;;  %3675 = vpow2.f32 %v1944_v47  ;;  %v2541_v41 = vld [vmem:[%s4645_s7 + $0x18] sm:$0xff] }
 0x36c   : > { %v3550_v43 = vpack.c.bf16 %v2541_v41, %v2540_v40 }
 0x36d   : > { %v4377_v34 = vpop.eup %3671  ;;  %v2107_v49 = vmul.f32 1.442695, %v2106_v44 }
 0x36e   : > { %v1599_v35 = vsel %vm1185_vm3, %v4377_v34, 0.0  ;;  %v2272_v45 = vpop.xlane.xlu1 %2271 }
 0x36f   : > { %1600 = vadd.xlane.f32.xlu1 %v1599_v35  ;;  %v2273_v48 = vsub.f32 %v2269_v12, %v2272_v45  ;;  %3677 = vpow2.f32 %v2107_v49 }
 0x371   : > { %v2274_v51 = vmul.f32 1.442695, %v2273_v48 }
 0x372   : > { %v2438_v46 = vpop.xlane.xlu0 %2437  ;;  %v1439_v54 = vpop.permute.xlu1 %1438 }
 0x373   : > { %v2439_v50 = vsub.f32 %v2435_v18, %v2438_v46  ;;  %3679 = vpow2.f32 %v2274_v51 }
 0x375   : > { %v2440_v52 = vmul.f32 1.442695, %v2439_v50 }
 0x377   : > { %3681 = vpow2.f32 %v2440_v52 }
 0x380   : > { %2115 = vrot.lane.b32.xlu1 %v4327_v37, %s3893_s29  ;;  %s4648_s29 = sld [smem:[#allocation27_spill]] }
 0x381   : > { %1604 = vrot.lane.b32.xlu0 %v4329_v39, %s3892_s22  ;;  %v3674_v39 = vpop.eup %3673 }
 0x382   : > { %v3676_v53 = vpop.eup %3675  ;;  %v1765_v55 = vsel %vm1185_vm3, %v3674_v39, 0.0 }
 0x383   : > { %v4386_v56 = vpop.eup %3677  ;;  %v1946_v59 = vsel %vm1185_vm3, %v3676_v53, 0.0 }
 0x384   : > { %v4388_v57 = vpop.eup %3679  ;;  %v2109_v60 = vsel %vm1185_vm3, %v4386_v56, 0.0 }
 0x385   : > { %v4393_v61 = vpop.eup %3681  ;;  %v2276_v62 = vsel %vm1185_vm3, %v4388_v57, 0.0 }
 0x386   : > { %v2442_v63 = vsel %vm1185_vm3, %v4393_v61, 0.0 }
 0x3a0   : > { %1766 = vadd.xlane.f32.xlu0 %v1765_v55 }
 0x3a3   : > { %v1271_v58 = vpop.xlane.xlu1 %1270 }
 0x3a4   : > { %3683 = vrcp.f32 %v1271_v58  ;;  %1947 = vadd.xlane.f32.xlu1 %v1946_v59  ;;  %2110 = vadd.xlane.f32.xlu0 %v2109_v60 }
 0x3a7   : > { %v1771_v2 = vpop.permute.xlu1 %1770 }
 0x3a8   : > { %2277 = vadd.xlane.f32.xlu1 %v2276_v62  ;;  %2443 = vadd.xlane.f32.xlu0 %v2442_v63 }
 0x3ae   : > { %v3684_v0 = vpop.eup %3683 }
 0x3af   : > { %v1273_v1 = vmul.f32 %v3684_v0, %v3668_v24  ;;  %v3270_v0 = vld [vmem:[%s4646_s1] ss:$0 sm:$0xff]  ;;  %s4653_s1 = sld [smem:[#allocation32_spill]] (!%p3283_p1) }
 0x3b1   : > { %3409 = vmatmul.mubr.msk.f32.vlgmr.msra.gmra.mrb[6].mxu1 %vm1185_vm3, %v1273_v1 }
 0x3b2   : > { %3417 = vmatpush3.msra.mxu1 %v1439_v54  ;;  %3418 = vmatprep.mubr.msk.f32.mxu1 %vm3891_vm2, %v3890_v16 }
 0x3b3   : > { %3426 = vmatprep.subr.mxu1 %v3890_v16 }
 0x3b9   : > { %2447 = vrot.lane.b32.xlu1 %v4327_v37, %s3894_s26  ;;  %s4649_s26 = scalar_lea.vmem %s4648_s29, %s4198_s24  ;;  %s4652_s24 = sld [smem:[#allocation31_spill]] (!%p3283_p1) }
 0x3be   : > { %2281 = vrot.lane.b32.xlu0 %v4327_v37, %s3892_s22 }
 0x3f8   : > { %v1434_v3 = vpop.xlane.xlu0 %1433 }
 0x3f9   : > { %3685 = vrcp.f32 %v1434_v3 }
 0x3fc   : > { %v1601_v4 = vpop.xlane.xlu1 %1600  ;;  %v1605_v8 = vpop.permute.xlu0 %1604 }
 0x3fd   : > { %3687 = vrcp.f32 %v1601_v4 }
 0x400   : > { %v2116_v11 = vpop.permute.xlu1 %2115 }
 0x403   : > { %v3686_v5 = vpop.eup %3685 }
 0x404   : > { %v1436_v6 = vmul.f32 %v3686_v5, %v3670_v32 }
 0x406   : > { %3419 = vmatmul.mubr.msk.f32.vlgmr.msra.gmra.mrb[8].mxu1 %vm1185_vm3, %v1436_v6 }
 0x407   : > { %v3688_v9 = vpop.eup %3687  ;;  %3427 = vmatpush3.msra.mxu1 %v1605_v8  ;;  %3428 = vmatprep.mubr.msk.f32.mxu1 %vm3891_vm2, %v3890_v16 }
 0x408   : > { %v1603_v10 = vmul.f32 %v3688_v9, %v4377_v34  ;;  %3436 = vmatprep.subr.mxu1 %v3890_v16 }
 0x40a   : > { %3429 = vmatmul.mubr.msk.f32.vlgmr.msra.gmra.mrb[10].mxu1 %vm1185_vm3, %v1603_v10 }
 0x40b   : > { %3437 = vmatpush3.msra.mxu1 %v1771_v2  ;;  %3438 = vmatprep.mubr.msk.f32.mxu1 %vm3891_vm2, %v3890_v16 }
 0x40c   : > { %3446 = vmatprep.subr.mxu1 %v3890_v16 }
 0x42d   : > { %v1767_v12 = vpop.xlane.xlu0 %1766 }
 0x42e   : > { %3689 = vrcp.f32 %v1767_v12 }
 0x431   : > { %v1948_v13 = vpop.xlane.xlu1 %1947  ;;  %v2111_v15 = vpop.xlane.xlu0 %2110 }
 0x432   : > { %3691 = vrcp.f32 %v1948_v13 }
 0x433   : > { %3693 = vrcp.f32 %v2111_v15 }
 0x435   : > { %v2278_v17 = vpop.xlane.xlu1 %2277  ;;  %v2444_v20 = vpop.xlane.xlu0 %2443 }
 0x436   : > { %3695 = vrcp.f32 %v2278_v17 }
 0x437   : > { %3697 = vrcp.f32 %v2444_v20  ;;  %v2677_v20 = vld [vmem:[%s4260_s30] sm:$0xff] }
 0x438   : > { %v3690_v18 = vpop.eup %3689 }
 0x439   : > { %v1769_v19 = vmul.f32 %v3690_v18, %v3674_v39  ;;  %v2282_v26 = vpop.permute.xlu0 %2281  ;;  %v2448_v28 = vpop.permute.xlu1 %2447 }
 0x43b   : > { %3439 = vmatmul.mubr.msk.f32.vlgmr.msra.gmra.mrb[12].mxu1 %vm1185_vm3, %v1769_v19 }
 0x43c   : > { %v3692_v21 = vpop.eup %3691  ;;  %3447 = vmatpush3.msra.mxu1 %v4327_v37  ;;  %3448 = vmatprep.mubr.msk.f32.mxu1 %vm3891_vm2, %v3890_v16 }
 0x43d   : > { %v1950_v22 = vmul.f32 %v3692_v21, %v3676_v53  ;;  %3456 = vmatprep.subr.mxu1 %v3890_v16  ;;  %v3694_v23 = vpop.eup %3693  ;;  %v2678_v21 = vld [vmem:[%s4260_s30 + $0x8] sm:$0xff] }
 0x43e   : > { %v2113_v24 = vmul.f32 %v3694_v23, %v4386_v56  ;;  %v2679_v23 = vld [vmem:[%s4260_s30 + $0x10] sm:$0xff] }
 0x43f   : > { %3449 = vmatmul.mubr.msk.f32.vlgmr.msra.gmra.mrb[14].mxu1 %vm1185_vm3, %v1950_v22  ;;  %v3554_v22 = vpack.c.bf16 %v2678_v21, %v2677_v20 }
 0x440   : > { %3457 = vmatpush3.msra.mxu1 %v2116_v11  ;;  %3458 = vmatprep.mubr.msk.f32.mxu1 %vm3891_vm2, %v3890_v16  ;;  %v3696_v25 = vpop.eup %3695 }
 0x441   : > { %3466 = vmatprep.subr.mxu1 %v3890_v16  ;;  %v2280_v37 = vmul.f32 %v3696_v25, %v4388_v57  ;;  %v3698_v27 = vpop.eup %3697 }
 0x442   : > { %v2446_v29 = vmul.f32 %v3698_v27, %v4393_v61  ;;  %v2773_v27 = vld [vmem:[%s4246_s17 + $0x10] sm:$0xff] }
 0x443   : > { %3459 = vmatmul.mubr.msk.f32.vlgmr.msra.gmra.mrb[16].mxu1 %vm1185_vm3, %v2113_v24  ;;  %v2680_v24 = vld [vmem:[%s4260_s30 + $0x18] sm:$0xff] }
 0x444   : > { %3467 = vmatpush3.msra.mxu1 %v2282_v26  ;;  %3468 = vmatprep.mubr.msk.f32.mxu1 %vm3891_vm2, %v3890_v16  ;;  %v3558_v25 = vpack.c.bf16 %v2680_v24, %v2679_v23  ;;  %v2771_v26 = vld [vmem:[%s4246_s17] sm:$0xff] }
 0x445   : > { %3476 = vmatprep.subr.mxu1 %v3890_v16  ;;  %v3281_v23 = vld [vmem:[%s903_s0] ss:$0 sm:$0xff] }
 0x447   : > { %3469 = vmatmul.mubr.msk.f32.vlgmr.msra.gmra.mrb[18].mxu1 %vm1185_vm3, %v2280_v37  ;;  %v2772_v37 = vld [vmem:[%s4246_s17 + $0x8] sm:$0xff] }
 0x448   : > { %3477 = vmatpush3.msra.mxu1 %v2448_v28  ;;  %3478 = vmatprep.mubr.msk.f32.mxu1 %vm3891_vm2, %v3890_v16  ;;  %v3546_v16 = vpack.c.bf16 %v2539_v38, %v2538_v36  ;;  %v3562_v28 = vpack.c.bf16 %v2772_v37, %v2771_v26  ;;  %v3282_v26 = vld [vmem:[%s906_s10] ss:$0 sm:$0xff] }
 0x449   : > { %3555 = vmatprep.subr.bf16.mxu1 %v3554_v22 }
 0x44a   : > { %3547 = vmatprep.subr.bf16.mxu0 %v3546_v16 }
 0x44b   : > { %3479 = vmatmul.mubr.msk.f32.vlgmr.msra.gmra.mrb[20].mxu1 %vm1185_vm3, %v2446_v29  ;;  %3549 = vmatpush3.bf16.msra.mxu0 %v3546_v16  ;;  %v2774_v29 = vld [vmem:[%s4246_s17 + $0x18] sm:$0xff] }
 0x44c   : > { %3551 = vmatprep.subr.bf16.mxu0 %v3550_v43  ;;  %3557 = vmatpush3.bf16.msra.mxu1 %v3554_v22 }
 0x44d   : > { %3559 = vmatprep.subr.bf16.mxu1 %v3558_v25 }
 0x44f   : > { %3553 = vmatpush3.bf16.msra.mxu0 %v3550_v43 }
 0x450   : > { %3561 = vmatpush3.bf16.msra.mxu1 %v3558_v25  ;;  %3563 = vmatprep.subr.bf16.mxu0 %v3562_v28 }
 0x484   : > { %v1343_v30 = vpop.f32.mrb[6].mxu1 }
 0x485   : > { %v3410_v31 = vpop.f32.mrb[7].mxu1 }
 0x486   : > { %v2775_v31 = vld [vmem:[%s4246_s17 + $0x20] sm:$0xff] }
 0x4d9   : > { %v1510_v32 = vpop.f32.mrb[8].mxu1 }
 0x4da   : > { %1847 = vrot.lane.b32.xlu0 %v1510_v32, %s3895_s2  ;;  %v3420_v33 = vpop.f32.mrb[9].mxu1  ;;  %v2776_v32 = vld [vmem:[%s4246_s17 + $0x28] sm:$0xff] }
 0x4db   : > { %v3570_v33 = vpack.c.bf16 %v2776_v32, %v2775_v31 }
 0x4dd   : > { %v1676_v34 = vpop.f32.mrb[10].mxu1 }
 0x4de   : > { %1851 = vrot.lane.b32.xlu1 %v1676_v34, %s3896_s20  ;;  %v3430_v35 = vpop.f32.mrb[11].mxu1 }
 0x50e   : > { %v1842_v42 = vpop.f32.mrb[12].mxu1 }
 0x50f   : > { %1855 = vrot.lane.b32.xlu1 %v1842_v42, %s3897_s5  ;;  %v3440_v44 = vpop.f32.mrb[13].mxu1  ;;  %v3273_v42 = vld [vmem:[%s4647_s16] ss:$0 sm:$0xff] }
 0x510   : > { %v3274_v44 = vld [vmem:[%s4649_s26] ss:$0 sm:$0xff] }
 0x512   : > { %v2020_v45 = vpop.f32.mrb[14].mxu1 }
 0x513   : > { %v3450_v46 = vpop.f32.mrb[15].mxu1 }
 0x516   : > { %v2187_v47 = vpop.f32.mrb[16].mxu1 }
 0x517   : > { %2524 = vrot.lane.b32.xlu0 %v2187_v47, %s3895_s2  ;;  %v3460_v48 = vpop.f32.mrb[17].mxu1 }
 0x51a   : > { %v2353_v49 = vpop.f32.mrb[18].mxu1 }
 0x51b   : > { %2528 = vrot.lane.b32.xlu0 %v2353_v49, %s3896_s20  ;;  %v3470_v50 = vpop.f32.mrb[19].mxu1 }
 0x51e   : > { %v2519_v51 = vpop.f32.mrb[20].mxu1 }
 0x51f   : > { %2532 = vrot.lane.b32.xlu1 %v2519_v51, %s3897_s5  ;;  %v3480_v52 = vpop.f32.mrb[21].mxu1  ;;  %v2777_v51 = vld [vmem:[%s4246_s17 + $0x30] sm:$0xff] }
 0x520   : > { %v2778_v52 = vld [vmem:[%s4246_s17 + $0x38] sm:$0xff] }
 0x54c   : > { %v1848_v39 = vpop.permute.xlu0 %1847 }
 0x54d   : > { %v1858_v54 = vsel %vm1185_vm3, %v1343_v30, %v1848_v39  ;;  %v3566_v30 = vpack.c.bf16 %v2774_v29, %v2773_v27  ;;  %v3574_v39 = vpack.c.bf16 %v2778_v52, %v2777_v51 }
 0x550   : > { %v1852_v53 = vpop.permute.xlu1 %1851 }
 0x551   : > { %v1860_v55 = vsel %vm1859_vm4, %v1858_v54, %v1852_v53  ;;  %v3275_v53 = vld [vmem:[%s892_s23] ss:$0 sm:$0xff] }
 0x581   : > { %v1856_v56 = vpop.permute.xlu1 %1855 }
 0x582   : > { %v1862_v57 = vsel %vm1861_vm5, %v1860_v55, %v1856_v56 }
 0x583   : > { %3489 = vmatprep.mubr.msk.f32.mxu0 %vm931_vm1, %v1862_v57 }
 0x589   : > { %v2525_v58 = vpop.permute.xlu0 %2524 }
 0x58a   : > { %v2535_v60 = vsel %vm1185_vm3, %v2020_v45, %v2525_v58 }
 0x58d   : > { %v2529_v59 = vpop.permute.xlu0 %2528 }
 0x58e   : > { %v2536_v61 = vsel %vm1859_vm4, %v2535_v60, %v2529_v59  ;;  %v3278_v60 = vld [vmem:[%s900_s25] ss:$0 sm:$0xff] }
 0x591   : > { %v2533_v62 = vpop.permute.xlu1 %2532 }
 0x592   : > { %v2537_v63 = vsel %vm1861_vm5, %v2536_v61, %v2533_v62 }
 0x593   : > { %3490 = vmatmul.mubr.msk.f32.vlgmr.msra.gmra.mrb[16].mxu0 %vm931_vm1, %v2537_v63 }
 0x594   : > { %3565 = vmatpush3.bf16.msra.mxu0 %v3562_v28 }
 0x595   : > { %3567 = vmatprep.subr.bf16.mxu0 %v3566_v30 }
 0x598   : > { %3569 = vmatpush3.bf16.msra.mxu0 %v3566_v30 }
 0x599   : > { %3571 = vmatprep.subr.bf16.mxu0 %v3570_v33 }
 0x59c   : > { %3573 = vmatpush3.bf16.msra.mxu0 %v3570_v33 }
 0x59d   : > { %3575 = vmatprep.subr.bf16.mxu0 %v3574_v39 }
 0x5a0   : > { %3577 = vmatpush3.bf16.msra.mxu0 %v3574_v39  ;;  %v3284_v39 = vld [vmem:[%s4652_s24] ss:$0 sm:$0xff] (!%p3283_p1) }
 0x666   : > { %v3491_v1 = vpop.f32.mrb[16].mxu0 }
 0x667   : > { %v2627_v2 = vadd.f32 %v3491_v1, %v3270_v0  ;;  %v2621_v3 = vpop.f32.mrb[17].mxu0 }
 0x668   : > { %v2622_v4 = vadd.f32 %v3270_v0, %v2621_v3 }
 0x669   : > { %v2631_v5 = vadd.f32 %v2627_v2, %v4273_v14 }
 0x66a   : > { %v2630_v6 = vadd.f32 %v2622_v4, %v4263_v7 }
 0x66b   : > { %v2637_v8 = vsel %vm931_vm1, %v2631_v5, 0.0 }
 0x66c   : > { %2638 = vadd.xlane.f32.xlu1 %v2637_v8  ;;  %v2634_v9 = vsel %vm931_vm1, %v2630_v6, 0.0 }
 0x66d   : > { %2635 = vadd.xlane.f32.xlu0 %v2634_v9 }
 0x6f9   : > { %v2639_v10 = vpop.xlane.xlu1 %2638 }
 0x6fa   : > { %v2642_v11 = vmul.f32 0.03125, %v2639_v10  ;;  %v2636_v12 = vpop.xlane.xlu0 %2635 }
 0x6fb   : > { %v2641_v13 = vmul.f32 0.03125, %v2636_v12 }
 0x6fc   : > { %v2644_v15 = vsub.f32 %v2631_v5, %v2642_v11 }
 0x6fd   : > { %v2643_v17 = vsub.f32 %v2630_v6, %v2641_v13 }
 0x6fe   : > { %v2646_v14 = vmul.f32 %v2644_v15, %v2644_v15 }
 0x6ff   : > { %v2645_v18 = vmul.f32 %v2643_v17, %v2643_v17 }
 0x700   : > { %v2650_v19 = vsel %vm931_vm1, %v2646_v14, 0.0 }
 0x701   : > { %v2647_v7 = vsel %vm931_vm1, %v2645_v18, 0.0 }
 0x702   : > { %2648 = vadd.xlane.f32.xlu0 %v2647_v7 }
 0x706   : > { %2651 = vadd.xlane.f32.xlu0 %v2650_v19 }
 0x78f   : > { %v2649_v34 = vpop.xlane.xlu0 %2648 }
 0x790   : > { %v2653_v35 = vmul.f32 0.03125, %v2649_v34 }
 0x792   : > { %v2655_v36 = vadd.f32 1e-05, %v2653_v35 }
 0x793   : > { %v2652_v38 = vpop.xlane.xlu0 %2651 }
 0x794   : > { %3699 = vrsqrt.f32 %v2655_v36  ;;  %v2654_v16 = vmul.f32 0.03125, %v2652_v38 }
 0x796   : > { %v2656_v40 = vadd.f32 1e-05, %v2654_v16 }
 0x798   : > { %3701 = vrsqrt.f32 %v2656_v40 }
 0x79e   : > { %v3700_v41 = vpop.eup %3699 }
 0x79f   : > { %v2659_v43 = vmul.f32 %v3700_v41, %v2643_v17 }
 0x7a1   : > { %v2667_v45 = vmul.f32 %v3273_v42, %v2659_v43 }
 0x7a2   : > { %v3702_v46 = vpop.eup %3701 }
 0x7a3   : > { %v2660_v47 = vmul.f32 %v3702_v46, %v2644_v15  ;;  %v2675_v48 = vadd.f32 %v3274_v44, %v2667_v45 }
 0x7a5   : > { %v2668_v49 = vmul.f32 %v3273_v42, %v2660_v47  ;;  %3500 = vmatprep.mubr.msk.f32.mxu1 %vm931_vm1, %v2675_v48 }
 0x7a7   : > { %v2676_v50 = vadd.f32 %v3274_v44, %v2668_v49 }
 0x7a9   : > { %3501 = vmatmul.mubr.msk.f32.vlgmr.msra.gmra.mrb[22].mxu1 %vm931_vm1, %v2676_v50 }
 0x87c   : > { %v3502_v54 = vpop.f32.mrb[22].mxu1 }
 0x87d   : > { %v2766_v55 = vadd.f32 %v3502_v54, %v3275_v53  ;;  %v2760_v56 = vpop.f32.mrb[23].mxu1  ;;  %v3285_v54 = vld [vmem:[%s4653_s1] ss:$0 sm:$0xff] (!%p3283_p1) }
 0x87e   : > { %v2761_v57 = vadd.f32 %v3275_v53, %v2760_v56 }
 0x87f   : > { %v2770_v59 = vmax.f32 %v2766_v55, 0.0 }
 0x880   : > { %v2769_v58 = vmax.f32 %v2761_v57, 0.0 }
 0x882   : > { %3519 = vmatprep.mubr.msk.f32.mxu0 %vm2786_vm6, %v2769_v58 }
 0x883   : > { %3520 = vmatmul.mubr.msk.f32.vlgmr.msra.gmra.mrb[18].mxu0 %vm2786_vm6, %v2770_v59 }
 0x956   : > { %v3521_v61 = vpop.f32.mrb[18].mxu0 }
 0x957   : > { %v2865_v62 = vadd.f32 %v3521_v61, %v3278_v60  ;;  %v2859_v63 = vpop.f32.mrb[19].mxu0 }
 0x958   : > { %v2860_v0 = vadd.f32 %v3278_v60, %v2859_v63 }
 0x959   : > { %v2869_v1 = vadd.f32 %v2865_v62, %v2676_v50 }
 0x95a   : > { %v2868_v2 = vadd.f32 %v2860_v0, %v2675_v48 }
 0x95b   : > { %v2875_v3 = vsel %vm931_vm1, %v2869_v1, 0.0 }
 0x95c   : > { %2876 = vadd.xlane.f32.xlu0 %v2875_v3  ;;  %v2872_v4 = vsel %vm931_vm1, %v2868_v2, 0.0 }
 0x95d   : > { %2873 = vadd.xlane.f32.xlu1 %v2872_v4 }
 0x9e9   : > { %v2877_v5 = vpop.xlane.xlu0 %2876 }
 0x9ea   : > { %v2879_v6 = vmul.f32 0.03125, %v2877_v5  ;;  %v2874_v8 = vpop.xlane.xlu1 %2873 }
 0x9eb   : > { %v2878_v9 = vmul.f32 0.03125, %v2874_v8 }
 0x9ec   : > { %v2881_v10 = vsub.f32 %v2869_v1, %v2879_v6 }
 0x9ed   : > { %v2880_v11 = vsub.f32 %v2868_v2, %v2878_v9 }
 0x9ee   : > { %v2883_v12 = vmul.f32 %v2881_v10, %v2881_v10 }
 0x9ef   : > { %v2882_v13 = vmul.f32 %v2880_v11, %v2880_v11 }
 0x9f0   : > { %v2887_v15 = vsel %vm931_vm1, %v2883_v12, 0.0 }
 0x9f1   : > { %2888 = vadd.xlane.f32.xlu0 %v2887_v15  ;;  %v2884_v17 = vsel %vm931_vm1, %v2882_v13, 0.0 }
 0x9f2   : > { %2885 = vadd.xlane.f32.xlu1 %v2884_v17 }
 0xa7e   : > { %v2889_v18 = vpop.xlane.xlu0 %2888 }
 0xa7f   : > { %v2891_v7 = vmul.f32 0.03125, %v2889_v18  ;;  %v2886_v14 = vpop.xlane.xlu1 %2885 }
 0xa80   : > { %v2890_v19 = vmul.f32 0.03125, %v2886_v14 }
 0xa81   : > { %v2893_v20 = vadd.f32 1e-05, %v2891_v7 }
 0xa82   : > { %v2892_v21 = vadd.f32 1e-05, %v2890_v19 }
 0xa83   : > { %3703 = vrsqrt.f32 %v2893_v20 }
 0xa84   : > { %3705 = vrsqrt.f32 %v2892_v21 }
 0xa8d   : > { %v3704_v22 = vpop.eup %3703 }
 0xa8e   : > { %v3706_v24 = vpop.eup %3705  ;;  %v2897_v25 = vmul.f32 %v3704_v22, %v2881_v10 }
 0xa8f   : > { %v2896_v37 = vmul.f32 %v3706_v24, %v2880_v11  ;;  %2919 = sbr.rel (%p3283_p1) target bundleno = 3035 (0xbdb), region = 116 }
 0xa90   : > { %v2905_v27 = vmul.f32 %v3281_v23, %v2897_v25 }
 0xa91   : > { %v2904_v28 = vmul.f32 %v3281_v23, %v2896_v37 }
 0xa92   : > { %v2913_v29 = vadd.f32 %v3282_v26, %v2905_v27 }
 0xa93   : > { %v2912_v30 = vadd.f32 %v3282_v26, %v2904_v28 }
 0xa94   : > { %2915 = vst.msk [vmem:[#allocation2 + $0x8] sm:$0xff] %vm931_vm1, %v2913_v29 }
 0xa95   : > { %2914 = vst.msk [vmem:[#allocation2] sm:$0xff] %vm931_vm1, %v2912_v30 }
 0xa9b   : > { %v2921_v32 = vld [vmem:[#allocation2 + $0x8] sm:$0xff] }
 0xa9c   : > { %v2920_v31 = vld [vmem:[#allocation2] sm:$0xff]  ;;  %v2927_v34 = vsel %vm931_vm1, %v2921_v32, 0.0 }
 0xa9d   : > { %v2924_v33 = vsel %vm931_vm1, %v2920_v31, 0.0 }
 0xa9e   : > { %2925 = vadd.xlane.f32.xlu0 %v2924_v33 }
 0xaa2   : > { %2928 = vadd.xlane.f32.xlu0 %v2927_v34 }
 0xb2b   : > { %v2926_v35 = vpop.xlane.xlu0 %2925 }
 0xb2c   : > { %v2930_v36 = vmul.f32 0.03125, %v2926_v35 }
 0xb2e   : > { %v2932_v38 = vsub.f32 %v2920_v31, %v2930_v36 }
 0xb2f   : > { %v2929_v16 = vpop.xlane.xlu0 %2928 }
 0xb30   : > { %v2931_v40 = vmul.f32 0.03125, %v2929_v16  ;;  %v2934_v41 = vmul.f32 %v2932_v38, %v2932_v38 }
 0xb32   : > { %v2933_v42 = vsub.f32 %v2921_v32, %v2931_v40  ;;  %v2936_v43 = vsel %vm931_vm1, %v2934_v41, 0.0 }
 0xb33   : > { %2937 = vadd.xlane.f32.xlu1 %v2936_v43 }
 0xb34   : > { %v2935_v44 = vmul.f32 %v2933_v42, %v2933_v42 }
 0xb36   : > { %v2939_v45 = vsel %vm931_vm1, %v2935_v44, 0.0 }
 0xb37   : > { %2940 = vadd.xlane.f32.xlu1 %v2939_v45 }
 0xbc0   : > { %v2938_v46 = vpop.xlane.xlu1 %2937 }
 0xbc1   : > { %v2942_v47 = vmul.f32 0.03125, %v2938_v46 }
 0xbc3   : > { %v2944_v48 = vadd.f32 1e-05, %v2942_v47 }
 0xbc4   : > { %v2941_v49 = vpop.xlane.xlu1 %2940 }
 0xbc5   : > { %3707 = vrsqrt.f32 %v2944_v48  ;;  %v2943_v50 = vmul.f32 0.03125, %v2941_v49 }
 0xbc7   : > { %v2945_v51 = vadd.f32 1e-05, %v2943_v50 }
 0xbc9   : > { %3709 = vrsqrt.f32 %v2945_v51 }
 0xbcf   : > { %v3708_v52 = vpop.eup %3707 }
 0xbd0   : > { %v2948_v53 = vmul.f32 %v3708_v52, %v2932_v38 }
 0xbd2   : > { %v2956_v55 = vmul.f32 %v3284_v39, %v2948_v53 }
 0xbd3   : > { %v3710_v56 = vpop.eup %3709 }
 0xbd4   : > { %v2964_v57 = vadd.f32 %v3285_v54, %v2956_v55  ;;  %v2949_v58 = vmul.f32 %v3710_v56, %v2933_v42 }
 0xbd6   : > { %2966 = vst.msk [vmem:[#allocation9] sm:$0xff] %vm931_vm1, %v2964_v57  ;;  %v2957_v59 = vmul.f32 %v3284_v39, %v2949_v58 }
 0xbd8   : > { %v2965_v60 = vadd.f32 %v3285_v54, %v2957_v59 }
 0xbda   : > { %2968 = vst.msk [vmem:[#allocation9 + $0x8] sm:$0xff] %vm931_vm1, %v2965_v60 }
 0xbdb PF: > { %s4654_s30 = sld [smem:[#allocation19_spill]]  ;;  %s3898_s28 = smov [#allocation9]  }
 0xbdc   : > { %s2978_s16 = sshll.u32 %s3898_s28, 4  ;;  %s2979_s16 = int_to_ptr.vmem [resolvable:$true] %s2978_s16 }
 0xbdd   : > { %s3799_s15 = scalar_lea.vmem %s2979_s16, 256  ;;  %p3806_p10 = scmp.lt.s32.totalorder %s2979_s16, %s2979_s16 }
 0xbde   : > { %p3800_p7 = scmp.ne.s32.totalorder %s2979_s16, %s3799_s15  ;;  %p3807_p8 = scmp.lt.s32.totalorder %s3799_s15, %s3799_s15 }
 0xbe0   : > { %p3808_p13 = por %p3807_p8, %p3806_p10 }
 0xbe1   : > { %p3604_p5 = scmp.eq.s32.totalorder %s4654_s30, 1 }
 0xbe3   : > { %p3801_p11 = pnand %p3800_p7, %p3604_p5 }
 0xbe5   : > { %p3802_p12 = pneg %p3801_p11 }
 0xbe7   : > { %p3809_p2 = pnand %p3808_p13, %p3802_p12 }
 0xbe9   : > { %3812 = shalt.err (!%p3809_p2)
}
 0xbea   : > { %s4655_s26 = sld [smem:[#allocation33_spill]] }
 0xbf0   : > { %s3813_s18 = scalar_lea.hbm %s4655_s26, 256 }
 0xbf1   : > { %p3814_p4 = scmp.ne.s32.totalorder %s4655_s26, %s3813_s18  ;;  %p3819_p9 = scmp.lt.u32.totalorder %s3813_s18, %s4655_s26 }
 0xbf3   : > { %p3815_p6 = pnand %p3814_p4, %p3604_p5 }
 0xbf5   : > { %p3816_p3 = pneg %p3815_p6 }
 0xbf7   : > { %p3821_p0 = pnand %p3819_p9, %p3816_p3 }
 0xbf9   : > { %3824 = shalt.err (!%p3821_p0)
}
 0xbfa   : > { %s3899_s23 = smov 128  }
 0xbfb   : > { %3587 = dma.vmem_to_hbm [thread:$0]  (%p3604_p5), %s2979_s16, 256, %s4655_s26, [#allocation5], %s3899_s23, %s3899_s23, %s3895_s2  }
 0xbfc   : > { %3858 = dma.done.wait (%p3604_p5), [#allocation5], 256  }
 0xbfd   : > { %3860 = vsyncadd (%p3604_p5), [#allocation5], 4294967040 }
 0xbfe PF: > { %s4656_s5 = sld [smem:[#allocation16_spill]]  ;;  %s4657_s0 = sld [smem:[#allocation13_spill]] }
 0xbff   : > { %s4658_s30 = sld [smem:[#allocation14_spill]]  ;;  %s4659_s20 = sld [smem:[#allocation18_spill]] }
 0xc00   : > { %s4660_s21 = sld [smem:[#allocation15_spill]]  ;;  %s4661_s1 = sld [smem:[#allocation17_spill]] }
 0xc04   : > { %s34_s22 = sadd.s32 1, %s4656_s5  }
 0xc05   : > { %p31_p1 = scmp.ge.s32.totalorder %s34_s22, 4  }
 0xc07   :  { %33 = sbr.rel (!%p31_p1) target bundleno = 20 (0x14), region = 203 }
 0xc0e   :  { %2994 = vsyncpa [#allocation4], 1 }
 0xc0f   :  { %2996 = vsyncpa [#allocation4 + $0x1], 1 }
 0xc10   :  { %2997 = vsyncpa [#allocation7], 1 }
 0xc11   :  { %2999 = vsyncpa [#allocation7 + $0x1], 1 }
 0xc12   :  { %3000 = vsyncpa [#allocation5], 1 }
 0xc13   :  { %3002 = vsyncpa [#allocation5 + $0x1], 1 }

</bundles_post_ra>
